<compile_context>
chip_gen: v7x
topology: tpu7x:2x2x1
jax: 0.10.0
libtpu: 0.0.40
codegen_flags: <defaults>
</compile_context>

<pallas_src>
import numpy as np
import jax
import jax.numpy as jnp
from jax.experimental import pallas as pl
from jax.experimental.pallas import tpu as pltpu

_HALF_LOG_2PI = float(0.5 * np.log(2.0 * np.pi))
_SIGMA_PRIOR = float(np.exp(-3.0))
_CONST_P = float(-_HALF_LOG_2PI - np.log(_SIGMA_PRIOR))        # prior log-normal constant
_INV_2SP2 = float(1.0 / (2.0 * _SIGMA_PRIOR * _SIGMA_PRIOR))   # 1 / (2 * sigma_prior^2)


def _bayes_linear_kernel(x_ref, wmu_ref, wrho_ref, weps_ref,
                         bmu_ref, brho_ref, beps_ref,
                         y_ref, logp_ref, logq_ref, acc_ref):
    k = pl.program_id(1)
    nk = pl.num_programs(1)

    # ---- weight tile: sample + log densities (dominant elementwise work) ----
    wmu = wmu_ref[...]                                   # (t_in, t_out)
    wrho = wrho_ref[...]
    weps = weps_ref[...]

    e_w = jnp.exp(wrho)                                  # reused: softplus + q-variance
    w_sigma = jnp.where(wrho > 20.0, wrho, jnp.log1p(e_w))   # stable softplus(rho)
    dw = w_sigma * weps                                  # weight - mu
    weight = wmu + dw                                    # sampled weight tile

    inv_e_w = pl.reciprocal(e_w, approx=True)            # 1 / exp(rho) on the EUP
    qw = dw * inv_e_w
    n_w = float(wmu.shape[0] * wmu.shape[1])
    tile_logp = _CONST_P * n_w - _INV_2SP2 * jnp.sum(weight * weight)
    tile_logq = -_HALF_LOG_2PI * n_w - jnp.sum(wrho) - 0.5 * jnp.sum(qw * qw)

    # ---- bias tile (contributes only once per out-tile; cost ~1/t_in of the above) ----
    bmu = bmu_ref[...]                                   # (1, t_out)
    brho = brho_ref[...]
    beps = beps_ref[...]
    e_b = jnp.exp(brho)
    b_sigma = jnp.where(brho > 20.0, brho, jnp.log1p(e_b))
    db = b_sigma * beps
    bias = bmu + db
    inv_e_b = pl.reciprocal(e_b, approx=True)
    qb = db * inv_e_b
    n_b = float(bmu.shape[0] * bmu.shape[1])
    bias_logp = _CONST_P * n_b - _INV_2SP2 * jnp.sum(bias * bias)
    bias_logq = -_HALF_LOG_2PI * n_b - jnp.sum(brho) - 0.5 * jnp.sum(qb * qb)

    is_first = k == 0
    tile_logp = tile_logp + jnp.where(is_first, bias_logp, 0.0)
    tile_logq = tile_logq + jnp.where(is_first, bias_logq, 0.0)

    # write-once per-(i,k) partial sums (lane-aligned block; reduced in the wrapper)
    logp_ref[...] = jnp.full(logp_ref.shape, tile_logp, dtype=jnp.float32)
    logq_ref[...] = jnp.full(logq_ref.shape, tile_logq, dtype=jnp.float32)

    # ---- y accumulation: init with bias at k == 0, finalize at the last K step ----
    @pl.when(is_first)
    def _():
        acc_ref[...] = jnp.broadcast_to(bias, acc_ref.shape)

    acc_ref[...] += jnp.dot(x_ref[...], weight, preferred_element_type=jnp.float32)

    @pl.when(k == nk - 1)
    def _():
        y_ref[...] = acc_ref[...].astype(y_ref.dtype)


def _pick_tile(dim, target):
    """Largest tile <= target that divides dim; fall back to a single full-dim tile."""
    if dim <= target:
        return dim
    if dim % target == 0:
        return target
    t = target
    while t > 8:
        t //= 2
        if dim % t == 0:
            return t
    return dim


def bayes_linear_forward(x, w_mu, w_rho, w_eps, b_mu, b_rho, b_eps,
                         *, tile_out=512, tile_in=512):
    """x: [B, in]; w_*: [out, in] (PyTorch F.linear layout); b_*: [out]."""
    B, in_f = x.shape
    out_f = w_mu.shape[0]

    # [out,in] -> [in,out] once so the MXU RHS needs no per-tile transpose and y is
    # lane-dense over out_features. (In a real model, store the params in this layout.)
    wT_mu, wT_rho, wT_eps = w_mu.T, w_rho.T, w_eps.T
    b_mu2 = b_mu.reshape(1, out_f)
    b_rho2 = b_rho.reshape(1, out_f)
    b_eps2 = b_eps.reshape(1, out_f)

    t_out = _pick_tile(out_f, tile_out)
    t_in = _pick_tile(in_f, tile_in)
    n_i = out_f // t_out            # out tiles (grid axis 0, "parallel")
    n_k = in_f // t_in              # in  tiles (grid axis 1, "arbitrary" reduction)

    w_spec = pl.BlockSpec((t_in, t_out), lambda i, k: (k, i))
    b_spec = pl.BlockSpec((1, t_out), lambda i, k: (0, i))
    part_spec = pl.BlockSpec((1, 1, 8, 128), lambda i, k: (i, k, 0, 0))

    y, logp_parts, logq_parts = pl.pallas_call(
        _bayes_linear_kernel,
        out_shape=(
            jax.ShapeDtypeStruct((B, out_f), x.dtype),
            jax.ShapeDtypeStruct((n_i, n_k, 8, 128), jnp.float32),
            jax.ShapeDtypeStruct((n_i, n_k, 8, 128), jnp.float32),
        ),
        grid_spec=pltpu.PrefetchScalarGridSpec(
            num_scalar_prefetch=0,
            grid=(n_i, n_k),
            in_specs=[
                pl.BlockSpec((B, t_in), lambda i, k: (0, k)),    # x
                w_spec, w_spec, w_spec,                          # wT_mu, wT_rho, wT_eps
                b_spec, b_spec, b_spec,                          # b_mu, b_rho, b_eps
            ],
            out_specs=(
                pl.BlockSpec((B, t_out), lambda i, k: (0, i)),   # y
                part_spec,                                       # log_p partials
                part_spec,                                       # log_q partials
            ),
            scratch_shapes=[pltpu.VMEM((B, t_out), jnp.float32)],
        ),
        compiler_params=pltpu.CompilerParams(
            dimension_semantics=("parallel", "arbitrary"),
            vmem_limit_bytes=64 * 1024 * 1024,
        ),
    )(x, wT_mu, wT_rho, wT_eps, b_mu2, b_rho2, b_eps2)

    log_p = jnp.sum(logp_parts[:, :, 0, 0])
    log_q = jnp.sum(logq_parts[:, :, 0, 0])
    kl = log_q - log_p
    return y, log_p, log_q, kl


def _reference(x, w_mu, w_rho, w_eps, b_mu, b_rho, b_eps):
    w_sigma = jnp.log(1.0 + jnp.exp(w_rho))
    b_sigma = jnp.log(1.0 + jnp.exp(b_rho))
    weight = w_mu + w_sigma * w_eps
    bias = b_mu + b_sigma * b_eps
    y = jnp.dot(x, weight.T, precision=jax.lax.Precision.HIGHEST) + bias

    def log_gauss(v, mu, sigma):
        return (-_HALF_LOG_2PI - np.log(abs(sigma))) - (v - mu) ** 2 / (2.0 * sigma ** 2)

    def log_gauss_logsigma(v, mu, logsigma):
        return -_HALF_LOG_2PI - logsigma - (v - mu) ** 2 / (2.0 * jnp.exp(logsigma) ** 2)

    log_p = log_gauss(weight, 0.0, _SIGMA_PRIOR).sum() + log_gauss(bias, 0.0, _SIGMA_PRIOR).sum()
    log_q = (log_gauss_logsigma(weight, w_mu, w_rho).sum()
             + log_gauss_logsigma(bias, b_mu, b_rho).sum())
    return y, log_p, log_q, log_q - log_p


if __name__ == "__main__":
    # Small but tile-able shapes: 128x128 tiles -> a 2x2 grid exercising accumulation.
    B, IN_F, OUT_F = 8, 256, 256

    key = jax.random.PRNGKey(0)
    k_x, k_wmu, k_wrho, k_bmu, k_brho, k_weps, k_beps = jax.random.split(key, 7)

    x = jax.random.normal(k_x, (B, IN_F), dtype=jnp.float32)
    # reset_parameters(): N(0, 0.05) for mu / rho.
    w_mu = 0.05 * jax.random.normal(k_wmu, (OUT_F, IN_F), dtype=jnp.float32)
    w_rho = 0.05 * jax.random.normal(k_wrho, (OUT_F, IN_F), dtype=jnp.float32)
    b_mu = 0.05 * jax.random.normal(k_bmu, (OUT_F,), dtype=jnp.float32)
    b_rho = 0.05 * jax.random.normal(k_brho, (OUT_F,), dtype=jnp.float32)
    # forward(): epsilon ~ N(0, exp(-3)); sampled with JAX RNG (torch samples internally).
    w_eps = _SIGMA_PRIOR * jax.random.normal(k_weps, (OUT_F, IN_F), dtype=jnp.float32)
    b_eps = _SIGMA_PRIOR * jax.random.normal(k_beps, (OUT_F,), dtype=jnp.float32)

    y, log_p, log_q, kl = bayes_linear_forward(
        x, w_mu, w_rho, w_eps, b_mu, b_rho, b_eps, tile_out=128, tile_in=128)
    jax.block_until_ready((y, log_p, log_q, kl))

    y_ref, log_p_ref, log_q_ref, kl_ref = _reference(x, w_mu, w_rho, w_eps, b_mu, b_rho, b_eps)
    np.testing.assert_allclose(np.asarray(y), np.asarray(y_ref), rtol=1e-5, atol=1e-4)
    np.testing.assert_allclose(float(log_p), float(log_p_ref), rtol=1e-4, atol=1e-2)
    np.testing.assert_allclose(float(log_q), float(log_q_ref), rtol=1e-4, atol=1e-2)
    np.testing.assert_allclose(float(kl), float(kl_ref), rtol=1e-4, atol=1e-2)

    print("KERNEL_OK")
</pallas_src>

<mosaic_0001>
module attributes {stable_mosaic.version = 11 : i64} {
  func.func @_bayes_linear_kernel(%arg0: i32, %arg1: i32, %arg2: memref<8x128xf32, #tpu.memory_space<vmem>>, %arg3: memref<128x128xf32, #tpu.memory_space<vmem>>, %arg4: memref<128x128xf32, #tpu.memory_space<vmem>>, %arg5: memref<128x128xf32, #tpu.memory_space<vmem>>, %arg6: memref<1x128xf32, #tpu.memory_space<vmem>>, %arg7: memref<1x128xf32, #tpu.memory_space<vmem>>, %arg8: memref<1x128xf32, #tpu.memory_space<vmem>>, %arg9: memref<8x128xf32, #tpu.memory_space<vmem>>, %arg10: memref<1x1x8x128xf32, #tpu.memory_space<vmem>>, %arg11: memref<1x1x8x128xf32, #tpu.memory_space<vmem>>, %arg12: memref<8x128xf32, #tpu.memory_space<vmem>>) attributes {dimension_semantics = [#tpu.dimension_semantics<parallel>, #tpu.dimension_semantics<arbitrary>], iteration_bounds = array<i64: 2, 2>, scalar_prefetch = 0 : i64, scratch_operands = 1 : i64, tpu.core_type = #tpu.core_type<tc>, window_params = [{transform_indices = @transform_0, window_bounds = array<i64: 8, 128>}, {transform_indices = @transform_1, window_bounds = array<i64: 128, 128>}, {transform_indices = @transform_2, window_bounds = array<i64: 128, 128>}, {transform_indices = @transform_3, window_bounds = array<i64: 128, 128>}, {transform_indices = @transform_4, window_bounds = array<i64: 1, 128>}, {transform_indices = @transform_5, window_bounds = array<i64: 1, 128>}, {transform_indices = @transform_6, window_bounds = array<i64: 1, 128>}, {transform_indices = @transform_7, window_bounds = array<i64: 8, 128>}, {transform_indices = @transform_8, window_bounds = array<i64: 1, 1, 8, 128>}, {transform_indices = @transform_9, window_bounds = array<i64: 1, 1, 8, 128>}]} {
    %c0 = arith.constant 0 : index
    %c0_0 = arith.constant 0 : index
    %0 = vector.load %arg3[%c0, %c0_0] : memref<128x128xf32, #tpu.memory_space<vmem>>, vector<128x128xf32>
    %c0_1 = arith.constant 0 : index
    %c0_2 = arith.constant 0 : index
    %1 = vector.load %arg4[%c0_1, %c0_2] : memref<128x128xf32, #tpu.memory_space<vmem>>, vector<128x128xf32>
    %c0_3 = arith.constant 0 : index
    %c0_4 = arith.constant 0 : index
    %2 = vector.load %arg5[%c0_3, %c0_4] : memref<128x128xf32, #tpu.memory_space<vmem>>, vector<128x128xf32>
    %3 = math.exp %1 : vector<128x128xf32>
    %cst = arith.constant 2.000000e+01 : f32
    %4 = vector.broadcast %cst : f32 to vector<128x128xf32>
    %5 = arith.cmpf ogt, %1, %4 : vector<128x128xf32>
    %6 = math.log1p %3 : vector<128x128xf32>
    %7 = arith.select %5, %1, %6 : vector<128x128xi1>, vector<128x128xf32>
    %8 = arith.mulf %7, %2 : vector<128x128xf32>
    %9 = arith.addf %0, %8 : vector<128x128xf32>
    %10 = tpu.reciprocal %3 {approx = true} : vector<128x128xf32> -> vector<128x128xf32>
    %11 = arith.mulf %8, %10 : vector<128x128xf32>
    %12 = arith.mulf %9, %9 : vector<128x128xf32>
    %13 = vector.shape_cast %12 : vector<128x128xf32> to vector<1x128x128xf32>
    %cst_5 = arith.constant dense<0.000000e+00> : vector<1xf32>
    %14 = vector.multi_reduction <add>, %13, %cst_5 [1, 2] : vector<1x128x128xf32> to vector<1xf32>
    %15 = vector.shape_cast %14 : vector<1xf32> to vector<1x1x1xf32>
    %16 = vector.extract %15[0, 0, 0] : f32 from vector<1x1x1xf32>
    %cst_6 = arith.constant 201.714401 : f32
    %17 = arith.mulf %cst_6, %16 : f32
    %cst_7 = arith.constant 34096.1094 : f32
    %18 = arith.subf %cst_7, %17 : f32
    %19 = vector.shape_cast %1 : vector<128x128xf32> to vector<1x128x128xf32>
    %cst_8 = arith.constant dense<0.000000e+00> : vector<1xf32>
    %20 = vector.multi_reduction <add>, %19, %cst_8 [1, 2] : vector<1x128x128xf32> to vector<1xf32>
    %21 = vector.shape_cast %20 : vector<1xf32> to vector<1x1x1xf32>
    %22 = vector.extract %21[0, 0, 0] : f32 from vector<1x1x1xf32>
    %cst_9 = arith.constant -15055.8887 : f32
    %23 = arith.subf %cst_9, %22 : f32
    %24 = arith.mulf %11, %11 : vector<128x128xf32>
    %25 = vector.shape_cast %24 : vector<128x128xf32> to vector<1x128x128xf32>
    %cst_10 = arith.constant dense<0.000000e+00> : vector<1xf32>
    %26 = vector.multi_reduction <add>, %25, %cst_10 [1, 2] : vector<1x128x128xf32> to vector<1xf32>
    %27 = vector.shape_cast %26 : vector<1xf32> to vector<1x1x1xf32>
    %28 = vector.extract %27[0, 0, 0] : f32 from vector<1x1x1xf32>
    %cst_11 = arith.constant 5.000000e-01 : f32
    %29 = arith.mulf %cst_11, %28 : f32
    %30 = arith.subf %23, %29 : f32
    %c0_12 = arith.constant 0 : index
    %c0_13 = arith.constant 0 : index
    %31 = vector.load %arg6[%c0_12, %c0_13] : memref<1x128xf32, #tpu.memory_space<vmem>>, vector<1x128xf32>
    %c0_14 = arith.constant 0 : index
    %c0_15 = arith.constant 0 : index
    %32 = vector.load %arg7[%c0_14, %c0_15] : memref<1x128xf32, #tpu.memory_space<vmem>>, vector<1x128xf32>
    %c0_16 = arith.constant 0 : index
    %c0_17 = arith.constant 0 : index
    %33 = vector.load %arg8[%c0_16, %c0_17] : memref<1x128xf32, #tpu.memory_space<vmem>>, vector<1x128xf32>
    %34 = math.exp %32 : vector<1x128xf32>
    %cst_18 = arith.constant 2.000000e+01 : f32
    %35 = vector.broadcast %cst_18 : f32 to vector<1x128xf32>
    %36 = arith.cmpf ogt, %32, %35 : vector<1x128xf32>
    %37 = math.log1p %34 : vector<1x128xf32>
    %38 = arith.select %36, %32, %37 : vector<1x128xi1>, vector<1x128xf32>
    %39 = arith.mulf %38, %33 : vector<1x128xf32>
    %40 = arith.addf %31, %39 : vector<1x128xf32>
    %41 = tpu.reciprocal %34 {approx = true} : vector<1x128xf32> -> vector<1x128xf32>
    %42 = arith.mulf %39, %41 : vector<1x128xf32>
    %43 = arith.mulf %40, %40 : vector<1x128xf32>
    %44 = vector.shape_cast %43 : vector<1x128xf32> to vector<1x1x128xf32>
    %cst_19 = arith.constant dense<0.000000e+00> : vector<1xf32>
    %45 = vector.multi_reduction <add>, %44, %cst_19 [1, 2] : vector<1x1x128xf32> to vector<1xf32>
    %46 = vector.shape_cast %45 : vector<1xf32> to vector<1x1x1xf32>
    %47 = vector.extract %46[0, 0, 0] : f32 from vector<1x1x1xf32>
    %cst_20 = arith.constant 201.714401 : f32
    %48 = arith.mulf %cst_20, %47 : f32
    %cst_21 = arith.constant 266.375854 : f32
    %49 = arith.subf %cst_21, %48 : f32
    %50 = vector.shape_cast %32 : vector<1x128xf32> to vector<1x1x128xf32>
    %cst_22 = arith.constant dense<0.000000e+00> : vector<1xf32>
    %51 = vector.multi_reduction <add>, %50, %cst_22 [1, 2] : vector<1x1x128xf32> to vector<1xf32>
    %52 = vector.shape_cast %51 : vector<1xf32> to vector<1x1x1xf32>
    %53 = vector.extract %52[0, 0, 0] : f32 from vector<1x1x1xf32>
    %cst_23 = arith.constant -117.62413 : f32
    %54 = arith.subf %cst_23, %53 : f32
    %55 = arith.mulf %42, %42 : vector<1x128xf32>
    %56 = vector.shape_cast %55 : vector<1x128xf32> to vector<1x1x128xf32>
    %cst_24 = arith.constant dense<0.000000e+00> : vector<1xf32>
    %57 = vector.multi_reduction <add>, %56, %cst_24 [1, 2] : vector<1x1x128xf32> to vector<1xf32>
    %58 = vector.shape_cast %57 : vector<1xf32> to vector<1x1x1xf32>
    %59 = vector.extract %58[0, 0, 0] : f32 from vector<1x1x1xf32>
    %cst_25 = arith.constant 5.000000e-01 : f32
    %60 = arith.mulf %cst_25, %59 : f32
    %61 = arith.subf %54, %60 : f32
    %c0_i32 = arith.constant 0 : i32
    %62 = arith.cmpi eq, %arg1, %c0_i32 : i32
    %cst_26 = arith.constant 0.000000e+00 : f32
    %63 = arith.select %62, %49, %cst_26 : f32
    %64 = arith.addf %18, %63 : f32
    %cst_27 = arith.constant 0.000000e+00 : f32
    %65 = arith.select %62, %61, %cst_27 : f32
    %66 = arith.addf %30, %65 : f32
    %67 = vector.broadcast %64 : f32 to vector<1x1x8x128xf32>
    %c0_28 = arith.constant 0 : index
    %c0_29 = arith.constant 0 : index
    %c0_30 = arith.constant 0 : index
    %c0_31 = arith.constant 0 : index
    %68 = vector.load %arg10[%c0_28, %c0_29, %c0_30, %c0_31] : memref<1x1x8x128xf32, #tpu.memory_space<vmem>>, vector<1x1x8x128xf32>
    tpu.vector_store %arg10[%c0_28, %c0_29, %c0_30, %c0_31], %67 {strides = array<i32>} : memref<1x1x8x128xf32, #tpu.memory_space<vmem>>, vector<1x1x8x128xf32>,
    %69 = vector.broadcast %66 : f32 to vector<1x1x8x128xf32>
    %c0_32 = arith.constant 0 : index
    %c0_33 = arith.constant 0 : index
    %c0_34 = arith.constant 0 : index
    %c0_35 = arith.constant 0 : index
    %70 = vector.load %arg11[%c0_32, %c0_33, %c0_34, %c0_35] : memref<1x1x8x128xf32, #tpu.memory_space<vmem>>, vector<1x1x8x128xf32>
    tpu.vector_store %arg11[%c0_32, %c0_33, %c0_34, %c0_35], %69 {strides = array<i32>} : memref<1x1x8x128xf32, #tpu.memory_space<vmem>>, vector<1x1x8x128xf32>,
    %71 = arith.extui %62 : i1 to i32
    %c0_i32_36 = arith.constant 0 : i32
    %72 = arith.cmpi ne, %71, %c0_i32_36 : i32
    scf.if %72 {
      %81 = vector.shape_cast %40 : vector<1x128xf32> to vector<1x128xf32>
      %82 = vector.broadcast %81 : vector<1x128xf32> to vector<8x128xf32>
      %c0_45 = arith.constant 0 : index
      %c0_46 = arith.constant 0 : index
      %83 = vector.load %arg12[%c0_45, %c0_46] : memref<8x128xf32, #tpu.memory_space<vmem>>, vector<8x128xf32>
      tpu.vector_store %arg12[%c0_45, %c0_46], %82 {strides = array<i32>} : memref<8x128xf32, #tpu.memory_space<vmem>>, vector<8x128xf32>,
    } else {
    }
    %c0_37 = arith.constant 0 : index
    %c0_38 = arith.constant 0 : index
    %73 = vector.load %arg12[%c0_37, %c0_38] : memref<8x128xf32, #tpu.memory_space<vmem>>, vector<8x128xf32>
    %c0_39 = arith.constant 0 : index
    %c0_40 = arith.constant 0 : index
    %74 = vector.load %arg2[%c0_39, %c0_40] : memref<8x128xf32, #tpu.memory_space<vmem>>, vector<8x128xf32>
    %cst_41 = arith.constant dense<0.000000e+00> : vector<8x128xf32>
    %75 = tpu.matmul %74, %9, %cst_41 {dimension_numbers = #tpu.dot_dimension_numbers<[1], [0], [0], [1], [0, 0, 1, 1], [], []>} : vector<8x128xf32>, vector<128x128xf32>, vector<8x128xf32> -> vector<8x128xf32>
    %76 = arith.addf %73, %75 : vector<8x128xf32>
    %c0_42 = arith.constant 0 : index
    %c0_43 = arith.constant 0 : index
    %77 = vector.load %arg12[%c0_42, %c0_43] : memref<8x128xf32, #tpu.memory_space<vmem>>, vector<8x128xf32>
    tpu.vector_store %arg12[%c0_42, %c0_43], %76 {strides = array<i32>} : memref<8x128xf32, #tpu.memory_space<vmem>>, vector<8x128xf32>,
    %c1_i32 = arith.constant 1 : i32
    %78 = arith.cmpi eq, %arg1, %c1_i32 : i32
    %79 = arith.extui %78 : i1 to i32
    %c0_i32_44 = arith.constant 0 : i32
    %80 = arith.cmpi ne, %79, %c0_i32_44 : i32
    scf.if %80 {
      %c0_45 = arith.constant 0 : index
      %c0_46 = arith.constant 0 : index
      %81 = vector.load %arg12[%c0_45, %c0_46] : memref<8x128xf32, #tpu.memory_space<vmem>>, vector<8x128xf32>
      %c0_47 = arith.constant 0 : index
      %c0_48 = arith.constant 0 : index
      %82 = vector.load %arg9[%c0_47, %c0_48] : memref<8x128xf32, #tpu.memory_space<vmem>>, vector<8x128xf32>
      tpu.vector_store %arg9[%c0_47, %c0_48], %81 {strides = array<i32>} : memref<8x128xf32, #tpu.memory_space<vmem>>, vector<8x128xf32>,
    } else {
    }
    return
  }
  func.func @transform_0(%arg0: i32, %arg1: i32) -> (i32, i32) {
    %c0_i32 = arith.constant 0 : i32
    %c0_i32_0 = arith.constant 0 : i32
    return %c0_i32, %arg1 : i32, i32
  }
  func.func @transform_1(%arg0: i32, %arg1: i32) -> (i32, i32) {
    %c0_i32 = arith.constant 0 : i32
    return %arg1, %arg0 : i32, i32
  }
  func.func @transform_2(%arg0: i32, %arg1: i32) -> (i32, i32) {
    %c0_i32 = arith.constant 0 : i32
    return %arg1, %arg0 : i32, i32
  }
  func.func @transform_3(%arg0: i32, %arg1: i32) -> (i32, i32) {
    %c0_i32 = arith.constant 0 : i32
    return %arg1, %arg0 : i32, i32
  }
  func.func @transform_4(%arg0: i32, %arg1: i32) -> (i32, i32) {
    %c0_i32 = arith.constant 0 : i32
    %c0_i32_0 = arith.constant 0 : i32
    return %c0_i32, %arg0 : i32, i32
  }
  func.func @transform_5(%arg0: i32, %arg1: i32) -> (i32, i32) {
    %c0_i32 = arith.constant 0 : i32
    %c0_i32_0 = arith.constant 0 : i32
    return %c0_i32, %arg0 : i32, i32
  }
  func.func @transform_6(%arg0: i32, %arg1: i32) -> (i32, i32) {
    %c0_i32 = arith.constant 0 : i32
    %c0_i32_0 = arith.constant 0 : i32
    return %c0_i32, %arg0 : i32, i32
  }
  func.func @transform_7(%arg0: i32, %arg1: i32) -> (i32, i32) {
    %c0_i32 = arith.constant 0 : i32
    %c0_i32_0 = arith.constant 0 : i32
    return %c0_i32, %arg0 : i32, i32
  }
  func.func @transform_8(%arg0: i32, %arg1: i32) -> (i32, i32, i32, i32) {
    %c0_i32 = arith.constant 0 : i32
    %c0_i32_0 = arith.constant 0 : i32
    %c0_i32_1 = arith.constant 0 : i32
    return %arg0, %arg1, %c0_i32, %c0_i32_0 : i32, i32, i32, i32
  }
  func.func @transform_9(%arg0: i32, %arg1: i32) -> (i32, i32, i32, i32) {
    %c0_i32 = arith.constant 0 : i32
    %c0_i32_0 = arith.constant 0 : i32
    %c0_i32_1 = arith.constant 0 : i32
    return %arg0, %arg1, %c0_i32, %c0_i32_0 : i32, i32, i32, i32
  }
}

</mosaic_0001>

<bundles_post_ra>
// kernel: tpu_custom_call.1
= control target key start
LH: loop header
LB: loop body
LE: loop exit
PB: predicated region body
PF: predicated region fallthrough
CT: control target
= control target key end

     0   :  { %s3742_s0 = inlined_call_operand.hbm [shape: f32[8,256], index: 0, kind: input, shape index: {}]   ;;  %s3743_s1 = inlined_call_operand.hbm [shape: f32[256,256], index: 1, kind: input, shape index: {}]   ;;  %s3744_s2 = inlined_call_operand.hbm [shape: f32[256,256], index: 2, kind: input, shape index: {}]   ;;  %s3745_s3 = inlined_call_operand.hbm [shape: f32[256,256], index: 3, kind: input, shape index: {}]   ;;  %s3746_s4 = inlined_call_operand.hbm [shape: f32[1,256], index: 4, kind: input, shape index: {}]   ;;  %s3747_s5 = inlined_call_operand.hbm [shape: f32[1,256], index: 5, kind: input, shape index: {}]   ;;  %s3748_s6 = inlined_call_operand.hbm [shape: f32[1,256], index: 6, kind: input, shape index: {}]   ;;  %s3749_s7 = inlined_call_operand.hbm [shape: f32[8,256], index: 7, kind: output, shape index: {0}]   ;;  %s3750_s8 = inlined_call_operand.hbm [shape: f32[2,2,8,128], index: 8, kind: output, shape index: {1}]   ;;  %s3751_s9 = inlined_call_operand.hbm [shape: f32[2,2,8,128], index: 9, kind: output, shape index: {2}]  }
   0x1   :  { %3843 = sst [smem:[#allocation70_spill]] %s3742_s0 }
   0x2   :  { %3844 = sst [smem:[#allocation71_spill]] %s3743_s1 }
   0x3   :  { %3845 = sst [smem:[#allocation72_spill]] %s3744_s2 }
   0x4   :  { %3846 = sst [smem:[#allocation73_spill]] %s3745_s3 }
   0x5   :  { %3847 = sst [smem:[#allocation74_spill]] %s3746_s4 }
   0x6   :  { %3848 = sst [smem:[#allocation75_spill]] %s3747_s5 }
   0x7   :  { %3849 = sst [smem:[#allocation76_spill]] %s3748_s6 }
   0x8   :  { %3850 = sst [smem:[#allocation77_spill]] %s3749_s7 }
   0x9   :  { %3851 = sst [smem:[#allocation78_spill]] %s3750_s8 }
   0xa   :  { %3852 = sst [smem:[#allocation79_spill]] %s3751_s9 }
   0xb   :  { %15 = vsyncpa [#allocation4], 0 }
   0xc   :  { %17 = vsyncpa [#allocation4 + $0x1], 0 }
   0xd   :  { %18 = vsyncpa [#allocation7], 0 }
   0xe   :  { %20 = vsyncpa [#allocation7 + $0x1], 0 }
   0xf   :  { %21 = vsyncpa [#allocation10], 0 }
  0x10   :  { %23 = vsyncpa [#allocation10 + $0x1], 0 }
  0x11   :  { %24 = vsyncpa [#allocation13], 0 }
  0x12   :  { %26 = vsyncpa [#allocation13 + $0x1], 0 }
  0x13   :  { %27 = vsyncpa [#allocation5], 0 }
  0x14   :  { %29 = vsyncpa [#allocation5 + $0x1], 0 }
  0x15   :  { %30 = vsyncpa [#allocation17], 0 }
  0x16   :  { %32 = vsyncpa [#allocation17 + $0x1], 0  ;;  %s2428_s30 = smov 0   ;;  %s2430_s10 = smov 0  }
  0x17   :  { %s2432_s11 = smov 0   ;;  %s2434_s12 = smov 0  }
  0x18   :  { %s2436_s13 = smov 0   ;;  %s2438_s14 = smov 0  }
  0x19   :  { %s2440_s15 = smov 0   ;;  %s2442_s16 = smov 0  }
  0x1a   :  { %s2444_s17 = smov 0   ;;  %s2446_s18 = smov 0  }
  0x1b   :  { %s2448_s19 = smov 0   ;;  %s2450_s20 = smov 0  }
  0x1c   :  { %s2452_s21 = smov 0   ;;  %s2454_s22 = smov 0  }
  0x1d LB: > { %3853 = sst [smem:[#allocation26_spill]] %s2308_s30  ;;  %s3754_s23 = sadd.s32 1, %s2352_s20  ;;  %s2360_s22 = sphi %s2454_s22, %s38_s22   ;;  %s2356_s21 = sphi %s2452_s21, %s4063_s21   ;;  %s2352_s20 = sphi %s2450_s20, %s4062_s20   ;;  %s2348_s19 = sphi %s2448_s19, %s4061_s19   ;;  %s2344_s18 = sphi %s2446_s18, %s4060_s18   ;;  %s2340_s17 = sphi %s2444_s17, %s4069_s17   ;;  %s2336_s16 = sphi %s2442_s16, %s4068_s16   ;;  %s2332_s15 = sphi %s2440_s15, %s4058_s15   ;;  %s2328_s14 = sphi %s2438_s14, %s4067_s14   ;;  %s2324_s13 = sphi %s2436_s13, %s4066_s13   ;;  %s2320_s12 = sphi %s2434_s12, %s4056_s12   ;;  %s2316_s11 = sphi %s2432_s11, %s4055_s11   ;;  %s2312_s10 = sphi %s2430_s10, %s4054_s10   ;;  %s2308_s30 = sphi %s2428_s30, %s4065_s30  }
  0x1e   : > { %3854 = sst [smem:[#allocation27_spill]] %s2312_s10  ;;  %p3763_p0 = scmp.eq.s32.totalorder %s2360_s22, 0 }
  0x1f   : > { %3855 = sst [smem:[#allocation28_spill]] %s2316_s11  ;;  %p2502_p1 = scmp.ge.s32.totalorder %s3754_s23, 2 }
  0x20   : > { %3856 = sst [smem:[#allocation29_spill]] %s2324_s13  ;;  %p3762_p2 = scmp.ne.s32.totalorder %s2328_s14, %s2324_s13 }
  0x21   : > { %3857 = sst [smem:[#allocation30_spill]] %s2332_s15  ;;  %p3761_p3 = scmp.lt.s32.totalorder %s2360_s22, 4 }
  0x22   : > { %3858 = sst [smem:[#allocation31_spill]] %s2336_s16  ;;  %s2511_s26 = sand.u32 1, %s2360_s22  }
  0x23   : > { %3859 = sst [smem:[#allocation32_spill]] %s2344_s18  ;;  %p94_p4 = por %p3762_p2, %p3763_p0 }
  0x24   : > { %3860 = sst [smem:[#allocation33_spill]] %s2348_s19  ;;  %s358_s27 = sand.u32 1, %s2328_s14  }
  0x25   : > { %3861 = sst [smem:[#allocation34_spill]] %s2352_s20  ;;  %s1563_s28 = sshll.u32 %s2352_s20, 5 }
  0x26   : > { %3862 = sst [smem:[#allocation35_spill]] %s2356_s21  ;;  %s2520_s29 = sshll.u32 %s358_s27, 7 }
  0x27   : > { %s3863_s24 = scalar_select %p2502_p1, 1, 0 }
  0x28   : > { %s366_s9 = sadd.s32 %s2356_s21, %s1563_s28  ;;  %s3864_s1 = sld [smem:[#allocation71_spill]] }
  0x29   : > { %s2523_s7 = sshll.u32 %s366_s9, 7  ;;  %s360_s19 = scalar_lea.vmem [#allocation6], %s2520_s29 }
  0x2a   : > { %s369_s18 = sshll.u32 %s360_s19, 4  ;;  %p2536_p5 = pnand %p3761_p3, %p94_p4  ;;  %s2532_s18 = int_to_ptr.vmem [resolvable:$true] %s369_s18 }
  0x2c   : > { %s3865_s27 = scalar_select %p2536_p5, 1, 0 }
  0x2d   : > { %p2545_p7 = pneg %p2536_p5 }
  0x2e   : > { %s2529_s25 = scalar_lea.hbm %s3864_s1, %s2523_s7  ;;  %s1933_s6 = scalar_lea.hbm %s3864_s1, 8192 }
  0x2f   : > { %s1928_s28 = scalar_lea.hbm %s2529_s25, 2048  ;;  %p1934_p10 = scmp.lt.u32.totalorder %s2529_s25, %s3864_s1 }
  0x30   : > { %p1929_p6 = scmp.ne.s32.totalorder %s2529_s25, %s1928_s28  ;;  %p1935_p11 = scmp.lt.u32.totalorder %s1933_s6, %s1928_s28 }
  0x31   : > { %s3866_s8 = scalar_select %p2545_p7, 1, 0 }
  0x32   : > { %p1931_p8 = pnand %p2545_p7, %p1929_p6  ;;  %p1936_p12 = por %p1935_p11, %p1934_p10 }
  0x33   : > { %p1937_p13 = scmp.lt.u32.totalorder %s1928_s28, %s2529_s25 }
  0x34   : > { %p1932_p9 = pneg %p1931_p8 }
  0x35   : > { %p1938_p4 = por %p1937_p13, %p1936_p12 }
  0x37   : > { %p1939_p3 = pnand %p1938_p4, %p1932_p9 }
  0x39   : > { %1942 = shalt.err (!%p1939_p3)
}
  0x3a   : > { %s1943_s9 = scalar_lea.vmem %s2532_s18, 2048  ;;  %s2362_s19 = smov [#allocation6]  }
  0x3b   : > { %p1944_p6 = scmp.ne.s32.totalorder %s2532_s18, %s1943_s9  ;;  %s1948_s23 = sshll.u32 %s2362_s19, 4  ;;  %s1949_s23 = int_to_ptr.vmem [resolvable:$false] %s1948_s23 }
  0x3c   : > { %s1950_s2 = scalar_lea.vmem %s1949_s23, 4096  ;;  %p1951_p0 = scmp.lt.s32.totalorder %s2532_s18, %s1949_s23 }
  0x3d   : > { %p1946_p8 = pnand %p1944_p6, %p2545_p7  ;;  %p1952_p1 = scmp.lt.s32.totalorder %s1950_s2, %s1943_s9 }
  0x3f   : > { %p1947_p2 = pneg %p1946_p8  ;;  %p1953_p10 = por %p1952_p1, %p1951_p0 }
  0x41   : > { %p1954_p11 = pnand %p1953_p10, %p1947_p2 }
  0x43   : > { %1957 = shalt.err (!%p1954_p11)
}
  0x44   : > { %s3766_s4 = smov 256   ;;  %s3768_s6 = smov 128  }
  0x45   : > { %s3772_s28 = smov 8   ;;  %s3867_s9 = scalar_lea.sflag [#allocation7], %s2511_s26 }
  0x46   : > { %1680 = dma.hbm_to_vmem [thread:$0]  (!%p2536_p5), %s2529_s25, 2048, %s2532_s18, %s3867_s9, %s3766_s4, %s3768_s6, %s3772_s28  }
  0x47   : > { %p1543_p0 = scmp.ge.s32.totalorder %s2360_s22, 1  ;;  %p474_p1 = scmp.lt.s32.totalorder %s2360_s22, 5 }
  0x48   : > { %s3870_s3 = sld [smem:[#allocation73_spill]]  ;;  %s406_s0 = scalar_lea.vmem [#allocation9], %s2520_s29 }
  0x49   : > { %p2575_p2 = pnand %p1543_p0, %p474_p1  ;;  %s415_s15 = sshll.u32 %s406_s0, 4  ;;  %s2586_s15 = int_to_ptr.vmem [resolvable:$true] %s415_s15 }
  0x4a   : > { %s3770_s18 = scalar_lea.sflag [#allocation10], %s2511_s26 }
  0x4b   : > { %s3868_s19 = scalar_select %p2575_p2, 1, 0 }
  0x4d   : > { %3869 = sst [smem:[#allocation36_spill]] %s3868_s19 }
  0x4e   : > { %s2583_s1 = scalar_lea.hbm %s3870_s3, %s2523_s7  ;;  %s1963_s23 = scalar_lea.hbm %s3870_s3, 8192 }
  0x4f   : > { %s1958_s25 = scalar_lea.hbm %s2583_s1, 2048  ;;  %p1964_p13 = scmp.lt.u32.totalorder %s2583_s1, %s3870_s3 }
  0x50   : > { %p1959_p3 = scmp.ne.s32.totalorder %s2583_s1, %s1958_s25  ;;  %p1965_p4 = scmp.lt.u32.totalorder %s1963_s23, %s1958_s25 }
  0x51   : > { %p1967_p8 = scmp.lt.u32.totalorder %s1958_s25, %s2583_s1 }
  0x52   : > { %p1961_p9 = pnand %p1959_p3, %p2545_p7  ;;  %p1966_p6 = por %p1965_p4, %p1964_p13 }
  0x54   : > { %p1962_p12 = pneg %p1961_p9  ;;  %p1968_p10 = por %p1967_p8, %p1966_p6 }
  0x56   : > { %p1969_p11 = pnand %p1968_p10, %p1962_p12 }
  0x58   : > { %1972 = shalt.err (!%p1969_p11)
}
  0x59   : > { %s1973_s0 = scalar_lea.vmem %s2586_s15, 2048  ;;  %s2366_s4 = smov [#allocation9]  }
  0x5a   : > { %p1974_p0 = scmp.ne.s32.totalorder %s2586_s15, %s1973_s0  ;;  %s1978_s9 = sshll.u32 %s2366_s4, 4  ;;  %s1979_s9 = int_to_ptr.vmem [resolvable:$false] %s1978_s9 }
  0x5b   : > { %s1980_s6 = scalar_lea.vmem %s1979_s9, 4096  ;;  %p1981_p9 = scmp.lt.s32.totalorder %s2586_s15, %s1979_s9 }
  0x5c   : > { %p1976_p1 = pnand %p1974_p0, %p2545_p7  ;;  %p1982_p2 = scmp.lt.s32.totalorder %s1980_s6, %s1973_s0 }
  0x5e   : > { %p1977_p3 = pneg %p1976_p1  ;;  %p1983_p13 = por %p1982_p2, %p1981_p9 }
  0x60   : > { %p1984_p4 = pnand %p1983_p13, %p1977_p3 }
  0x62   : > { %1987 = shalt.err (!%p1984_p4)
}
  0x63   : > { %s3871_s25 = smov 128   ;;  %s3872_s23 = smov 256  }
  0x64   : > { %1686 = dma.hbm_to_vmem [thread:$0]  (!%p2536_p5), %s2583_s1, 2048, %s2586_s15, %s3770_s18, %s3872_s23, %s3871_s25, %s3772_s28  }
  0x65   : > { %s2616_s2 = sadd.s32 4294967295, %s2360_s22   ;;  %s3781_s0 = sadd.s32 4294967294, %s2360_s22  }
  0x66   : > { %3873 = sst [smem:[#allocation37_spill]] %s2616_s2  ;;  %s50_s4 = sadd.s32 1, %s2356_s21 }
  0x67   : > { %p3775_p2 = scmp.eq.s32.totalorder %s2616_s2, 0  ;;  %p3874_p12 = scmp.ne.s32.totalorder %s3863_s24, 0 }
  0x68   : > { %p3771_p6 = scmp.ne.s32.totalorder %s2324_s13, %s2320_s12  ;;  %s167_s9 = sadd.s32 1, %s2316_s11 }
  0x69   : > { %s4071_s4 = smov (!%p3874_p12, %s50_s4), %s2356_s21  ;;  %p174_p10 = scmp.ne.s32.totalorder %s2316_s11, %s2312_s10 }
  0x6a   : > { %p52_p8 = scmp.ge.s32.totalorder %s4071_s4, 2  ;;  %p2634_p11 = por %p3771_p6, %p3775_p2 }
  0x6b   : > { %p180_p0 = scmp.ne.s32.totalorder %s2312_s10, %s2308_s30  ;;  %p3878_p1 = scmp.eq.s32.totalorder %s2360_s22, 0 }
  0x6c   : > { %s3875_s1 = scalar_select %p2634_p11, 1, 0 }
  0x6d   : > { %s4073_s4 = smov (%p52_p8, %s4071_s4), 0  ;;  %p2644_p3 = por %p174_p10, %p3878_p1 }
  0x6e   : > { %3876 = sst [smem:[#allocation38_spill]] %s3875_s1  ;;  %p2650_p9 = por %p180_p0, %p3775_p2 }
  0x6f   : > { %3877 = sst [smem:[#allocation39_spill]] %s4073_s4  ;;  %s2656_s18 = ssub.s32 %s2356_s21, %s4073_s4 }
  0x70   : > { %s3880_s6 = scalar_select %p2650_p9, 1, 0 }
  0x71   : > { %p256_p13 = scmp.eq.s32.totalorder %s2616_s2, 3  ;;  %p165_p4 = scmp.eq.s32.totalorder %s2656_s18, 0 }
  0x72   : > { %3881 = sst [smem:[#allocation40_spill]] %s3880_s6  ;;  %p262_p8 = scmp.eq.s32.totalorder %s3781_s0, 3 }
  0x73   : > { %p2662_p6 = por %p256_p13, %p174_p10  ;;  %p3884_p1 = scmp.ne.s32.totalorder %s2328_s14, %s2324_s13 }
  0x74   : > { %s2674_s30 = scalar_select %p165_p4, %s2316_s11, %s167_s9  }
  0x75   : > { %s3882_s28 = scalar_select %p2662_p6, 1, 0 }
  0x76   : > { %p2669_p11 = por %p256_p13, %p3884_p1  ;;  %3887 = sst [smem:[#allocation43_spill]] %s2674_s30 }
  0x77   : > { %3883 = sst [smem:[#allocation41_spill]] %s3882_s28  ;;  %p2676_p2 = por %p262_p8, %p180_p0 }
  0x78   : > { %s3885_s3 = scalar_select %p2669_p11, 1, 0 }
  0x79   : > { %s3888_s4 = scalar_select %p2676_p2, 1, 0 }
  0x7a   : > { %3886 = sst [smem:[#allocation42_spill]] %s3885_s3  ;;  %p3890_p9 = scmp.ne.s32.totalorder %s2324_s13, %s2320_s12 }
  0x7b   : > { %3889 = sst [smem:[#allocation44_spill]] %s3888_s4  ;;  %s2688_s0 = sand.u32 1, %s2316_s11  }
  0x7c   : > { %p2683_p5 = por %p262_p8, %p3890_p9  ;;  %s2691_s28 = sshll.u32 %s2356_s21, 4 }
  0x7d   : > { %p3893_p10 = scmp.lt.s32.totalorder %s2360_s22, 4  ;;  %s3896_s5 = sld [smem:[#allocation75_spill]] }
  0x7e   : > { %s3891_s6 = scalar_select %p2683_p5, 1, 0 }
  0x7f   : > { %p2697_p13 = pnand %p3893_p10, %p2644_p3  ;;  %s445_s11 = scalar_lea.vmem [#allocation12], %s2688_s0 }
  0x80   : > { %3892 = sst [smem:[#allocation45_spill]] %s3891_s6  ;;  %s452_s21 = sshll.u32 %s445_s11, 4  ;;  %s2708_s21 = int_to_ptr.vmem [resolvable:$true] %s452_s21 }
  0x81   : > { %s3894_s9 = scalar_select %p2697_p13, 1, 0 }
  0x82   : > { %p2715_p3 = pneg %p2697_p13 }
  0x83   : > { %3895 = sst [smem:[#allocation46_spill]] %s3894_s9  ;;  %s2705_s12 = scalar_lea.hbm %s3896_s5, %s2691_s28 }
  0x84   : > { %s1988_s6 = scalar_lea.hbm %s2705_s12, 16  ;;  %s1993_s10 = scalar_lea.hbm %s3896_s5, 32 }
  0x85   : > { %p1989_p0 = scmp.ne.s32.totalorder %s2705_s12, %s1988_s6  ;;  %p1994_p8 = scmp.lt.u32.totalorder %s2705_s12, %s3896_s5 }
  0x86   : > { %p1995_p1 = scmp.lt.u32.totalorder %s1993_s10, %s1988_s6  ;;  %p1997_p5 = scmp.lt.u32.totalorder %s1988_s6, %s2705_s12 }
  0x87   : > { %p1991_p9 = pnand %p2715_p3, %p1989_p0 }
  0x88   : > { %p1996_p10 = por %p1995_p1, %p1994_p8 }
  0x89   : > { %p1992_p4 = pneg %p1991_p9 }
  0x8a   : > { %p1998_p2 = por %p1997_p5, %p1996_p10 }
  0x8c   : > { %p1999_p6 = pnand %p1998_p2, %p1992_p4 }
  0x8e   : > { %2002 = shalt.err (!%p1999_p6)
}
  0x8f   : > { %s2003_s15 = scalar_lea.vmem %s2708_s21, 16  ;;  %s2367_s3 = smov [#allocation12]  }
  0x90   : > { %p2004_p0 = scmp.ne.s32.totalorder %s2708_s21, %s2003_s15  ;;  %s2008_s30 = sshll.u32 %s2367_s3, 4  ;;  %s2009_s30 = int_to_ptr.vmem [resolvable:$false] %s2008_s30 }
  0x91   : > { %s2010_s1 = scalar_lea.vmem %s2009_s30, 32  ;;  %p2011_p7 = scmp.lt.s32.totalorder %s2708_s21, %s2009_s30 }
  0x92   : > { %p2006_p9 = pnand %p2004_p0, %p2715_p3  ;;  %p2012_p12 = scmp.lt.s32.totalorder %s2010_s1, %s2003_s15 }
  0x94   : > { %p2007_p11 = pneg %p2006_p9  ;;  %p2013_p8 = por %p2012_p12, %p2011_p7 }
  0x96   : > { %p2014_p1 = pnand %p2013_p8, %p2007_p11 }
  0x98   : > { %2017 = shalt.err (!%p2014_p1)
}
  0x99   : > { %s3898_s10 = scalar_lea.sflag [#allocation13], %s2511_s26  ;;  %s3899_s6 = sld [smem:[#allocation30_spill]] }
  0x9a   : > { %1692 = dma.hbm_to_vmem [thread:$0]  (!%p2697_p13), %s2705_s12, 16, %s2708_s21, %s3898_s10  }
  0x9b   : > { %s57_s15 = sadd.s32 1, %s2340_s17  ;;  %s3900_s11 = sadd.s32 1, %s2352_s20 }
  0x9c   : > { %p3901_p5 = scmp.ne.s32.totalorder %s3863_s24, 0  ;;  %p64_p7 = scmp.ne.s32.totalorder %s2340_s17, %s2336_s16 }
  0x9d   : > { %s338_s30 = sand.u32 1, %s2340_s17   ;;  %p3903_p6 = scmp.eq.s32.totalorder %s2360_s22, 0 }
  0x9e   : > { %s4075_s11 = smov (%p3901_p5, %s3900_s11), 0  ;;  %p3904_p4 = scmp.eq.s32.totalorder %s2616_s2, 0 }
  0x9f   : > { %3902 = sst [smem:[#allocation47_spill]] %s4075_s11  ;;  %p70_p2 = scmp.ne.s32.totalorder %s2336_s16, %s3899_s6 }
  0xa0   : > { %s54_s3 = ssub.s32 %s2352_s20, %s4075_s11  ;;  %p66_p11 = por %p3903_p6, %p64_p7 }
  0xa1   : > { %p55_p12 = scmp.eq.s32.totalorder %s54_s3, 0  ;;  %p2758_p10 = por %p3904_p4, %p70_p2 }
  0xa2   : > { %s82_s21 = sor.u32 %s2656_s18, %s54_s3  ;;  %s1526_s24 = sshll.u32 %s338_s30, 3 }
  0xa3   : > { %s3905_s1 = scalar_select %p2758_p10, 1, 0 }
  0xa4   : > { %s2764_s12 = scalar_select %p55_p12, %s2340_s17, %s57_s15  }
  0xa5   : > { %3906 = sst [smem:[#allocation30_spill]] %s3905_s1  ;;  %p83_p0 = scmp.eq.s32.totalorder %s82_s21, 0 }
  0xa6   : > { %3907 = sst [smem:[#allocation48_spill]] %s2764_s12  ;;  %s1527_s10 = sshll.u32 %s2352_s20, 7 }
  0xa7   : > { %s3908_s5 = sadd.s32 1, %s2328_s14  ;;  %s3909_s16 = sld [smem:[#allocation70_spill]] }
  0xa8   : > { %s2770_s13 = scalar_select %p83_p0, %s2328_s14, %s3908_s5  }
  0xa9   : > { %s342_s2 = scalar_lea.vmem [#allocation3], %s1526_s24  ;;  %p3911_p9 = scmp.lt.s32.totalorder %s2360_s22, 4 }
  0xaa   : > { %s349_s1 = sshll.u32 %s342_s2, 4  ;;  %s3913_s11 = sld [smem:[#allocation72_spill]]  ;;  %s2783_s1 = int_to_ptr.vmem [resolvable:$true] %s349_s1 }
  0xab   : > { %p2779_p8 = pnand %p3911_p9, %p66_p11  ;;  %s339_s21 = scalar_lea.sflag [#allocation4], %s338_s30 }
  0xad   : > { %s3910_s9 = smov %s3909_s16  ;;  %s2775_s19 = scalar_lea.hbm %s3909_s16, %s1527_s10 }
  0xae   : > { %s2018_s10 = scalar_lea.hbm %s2775_s19, 128  ;;  %p2020_p5 = pneg %p2779_p8 }
  0xaf   : > { %p2019_p1 = scmp.ne.s32.totalorder %s2775_s19, %s2018_s10  ;;  %s2023_s6 = scalar_lea.hbm %s3910_s9, 256 }
  0xb0   : > { %s3914_s3 = smov %s3913_s11  ;;  %s2789_s16 = scalar_lea.hbm %s3913_s11, %s2523_s7 }
  0xb1   : > { %p2021_p7 = pnand %p2020_p5, %p2019_p1  ;;  %p2024_p12 = scmp.lt.u32.totalorder %s2775_s19, %s3910_s9 }
  0xb2   : > { %p2025_p6 = scmp.lt.u32.totalorder %s2023_s6, %s2018_s10  ;;  %p2027_p4 = scmp.lt.u32.totalorder %s2018_s10, %s2775_s19 }
  0xb3   : > { %p2022_p2 = pneg %p2021_p7 }
  0xb4   : > { %p2026_p11 = por %p2025_p6, %p2024_p12 }
  0xb6   : > { %p2028_p0 = por %p2027_p4, %p2026_p11 }
  0xb8   : > { %p2029_p9 = pnand %p2028_p0, %p2022_p2 }
  0xba   : > { %2032 = shalt.err (!%p2029_p9)
}
  0xbb   : > { %s2033_s7 = scalar_lea.vmem %s2783_s1, 128  ;;  %s2368_s30 = smov [#allocation3]  }
  0xbc   : > { %p2034_p1 = scmp.ne.s32.totalorder %s2783_s1, %s2033_s7  ;;  %s2038_s5 = sshll.u32 %s2368_s30, 4  ;;  %s2039_s5 = int_to_ptr.vmem [resolvable:$false] %s2038_s5 }
  0xbd   : > { %s2040_s20 = scalar_lea.vmem %s2039_s5, 256  ;;  %p2041_p13 = scmp.lt.s32.totalorder %s2783_s1, %s2039_s5 }
  0xbe   : > { %p2036_p7 = pnand %p2034_p1, %p2020_p5  ;;  %p2042_p12 = scmp.lt.s32.totalorder %s2040_s20, %s2033_s7 }
  0xc0   : > { %p2037_p10 = pneg %p2036_p7  ;;  %p2043_p6 = por %p2042_p12, %p2041_p13 }
  0xc2   : > { %p2044_p11 = pnand %p2043_p6, %p2037_p10 }
  0xc4   : > { %2047 = shalt.err (!%p2044_p11)
}
  0xc5   : > { %1677 = dma.hbm_to_vmem [thread:$0]  (!%p2779_p8), %s2775_s19, 128, %s2783_s1, %s339_s21  }
  0xc6   : > { %s383_s12 = scalar_lea.vmem [#allocation8], %s2520_s29  ;;  %s3915_s2 = sld [smem:[#allocation74_spill]] }
  0xc7   : > { %s392_s15 = sshll.u32 %s383_s12, 4  ;;  %s2048_s18 = scalar_lea.hbm %s2789_s16, 2048  ;;  %s2817_s15 = int_to_ptr.vmem [resolvable:$true] %s392_s15 }
  0xc8   : > { %p2049_p13 = scmp.ne.s32.totalorder %s2789_s16, %s2048_s18  ;;  %p3916_p10 = scmp.ne.s32.totalorder %s3866_s8, 0 }
  0xc9   : > { %s2053_s30 = scalar_lea.hbm %s3914_s3, 8192  ;;  %p2054_p8 = scmp.lt.u32.totalorder %s2789_s16, %s3914_s3 }
  0xca   : > { %p2051_p5 = pnand %p2049_p13, %p3916_p10  ;;  %p2055_p4 = scmp.lt.u32.totalorder %s2053_s30, %s2048_s18 }
  0xcb   : > { %p2057_p9 = scmp.lt.u32.totalorder %s2048_s18, %s2789_s16 }
  0xcc   : > { %s2823_s24 = scalar_lea.hbm %s3915_s2, %s2691_s28  ;;  %p2052_p2 = pneg %p2051_p5 }
  0xcd   : > { %p2056_p0 = por %p2055_p4, %p2054_p8 }
  0xcf   : > { %p2058_p1 = por %p2057_p9, %p2056_p0 }
  0xd1   : > { %p2059_p7 = pnand %p2058_p1, %p2052_p2 }
  0xd3   : > { %2062 = shalt.err (!%p2059_p7)
}
  0xd4   : > { %s2063_s29 = scalar_lea.vmem %s2817_s15, 2048  ;;  %s2369_s1 = smov [#allocation8]  }
  0xd5   : > { %p2064_p12 = scmp.ne.s32.totalorder %s2817_s15, %s2063_s29  ;;  %s2068_s21 = sshll.u32 %s2369_s1, 4  ;;  %s2069_s21 = int_to_ptr.vmem [resolvable:$false] %s2068_s21 }
  0xd6   : > { %s2070_s20 = scalar_lea.vmem %s2069_s21, 4096  ;;  %p2071_p13 = scmp.lt.s32.totalorder %s2817_s15, %s2069_s21 }
  0xd7   : > { %p2066_p6 = pnand %p2064_p12, %p3916_p10  ;;  %p2072_p5 = scmp.lt.s32.totalorder %s2070_s20, %s2063_s29 }
  0xd9   : > { %p2067_p11 = pneg %p2066_p6  ;;  %p2073_p8 = por %p2072_p5, %p2071_p13 }
  0xdb   : > { %p2074_p4 = pnand %p2073_p8, %p2067_p11 }
  0xdd   : > { %2077 = shalt.err (!%p2074_p4)
}
  0xde   : > { %p3917_p2 = scmp.ne.s32.totalorder %s3865_s27, 0  ;;  %s3918_s12 = smov 8  }
  0xdf   : > { %s3919_s11 = scalar_lea.sflag [#allocation7], %s2511_s26  ;;  %s428_s8 = scalar_lea.vmem [#allocation11], %s2688_s0 }
  0xe0   : > { %1683 = dma.hbm_to_vmem [thread:$0]  (!%p3917_p2), %s2789_s16, 2048, %s2817_s15, %s3919_s11, %s3872_s23, %s3871_s25, %s3918_s12  }
  0xe1   : > { %s435_s10 = sshll.u32 %s428_s8, 4  ;;  %s3920_s6 = sld [smem:[#allocation76_spill]]  ;;  %s436_s10 = int_to_ptr.vmem [resolvable:$true] %s435_s10 }
  0xe2   : > { %s2078_s30 = scalar_lea.hbm %s2823_s24, 16  ;;  %s2083_s29 = scalar_lea.hbm %s3915_s2, 32 }
  0xe3   : > { %p2079_p10 = scmp.ne.s32.totalorder %s2823_s24, %s2078_s30  ;;  %p2084_p1 = scmp.lt.u32.totalorder %s2823_s24, %s3915_s2 }
  0xe4   : > { %p2085_p7 = scmp.lt.u32.totalorder %s2083_s29, %s2078_s30  ;;  %p2087_p6 = scmp.lt.u32.totalorder %s2078_s30, %s2823_s24 }
  0xe5   : > { %p2081_p0 = pnand %p2079_p10, %p2715_p3 }
  0xe6   : > { %p2086_p12 = por %p2085_p7, %p2084_p1 }
  0xe7   : > { %s2856_s7 = scalar_lea.hbm %s3920_s6, %s2691_s28  ;;  %p2082_p9 = pneg %p2081_p0 }
  0xe8   : > { %p2088_p11 = por %p2087_p6, %p2086_p12 }
  0xea   : > { %p2089_p13 = pnand %p2088_p11, %p2082_p9 }
  0xec   : > { %2092 = shalt.err (!%p2089_p13)
}
  0xed   : > { %s2093_s28 = scalar_lea.vmem %s436_s10, 16  ;;  %s2370_s25 = smov [#allocation11]  }
  0xee   : > { %p2094_p5 = scmp.ne.s32.totalorder %s436_s10, %s2093_s28  ;;  %s2098_s23 = sshll.u32 %s2370_s25, 4  ;;  %s2099_s23 = int_to_ptr.vmem [resolvable:$false] %s2098_s23 }
  0xef   : > { %s2100_s16 = scalar_lea.vmem %s2099_s23, 32  ;;  %p2101_p2 = scmp.lt.s32.totalorder %s436_s10, %s2099_s23 }
  0xf0   : > { %p2096_p8 = pnand %p2094_p5, %p2715_p3  ;;  %p2102_p10 = scmp.lt.s32.totalorder %s2100_s16, %s2093_s28 }
  0xf2   : > { %p2097_p4 = pneg %p2096_p8  ;;  %p2103_p0 = por %p2102_p10, %p2101_p2 }
  0xf4   : > { %p2104_p1 = pnand %p2103_p0, %p2097_p4 }
  0xf6   : > { %2107 = shalt.err (!%p2104_p1)
}
  0xf7   : > { %s3921_s15 = sld [smem:[#allocation46_spill]]  ;;  %s3923_s20 = scalar_lea.sflag [#allocation10], %s2511_s26 }
  0xf8   : > { %s462_s12 = scalar_lea.vmem [#allocation14], %s2688_s0  ;;  %s2108_s8 = scalar_lea.hbm %s2856_s7, 16 }
  0xf9   : > { %s469_s11 = sshll.u32 %s462_s12, 4  ;;  %p2109_p9 = scmp.ne.s32.totalorder %s2856_s7, %s2108_s8  ;;  %s470_s11 = int_to_ptr.vmem [resolvable:$true] %s469_s11 }
  0xfa   : > { %s2113_s30 = scalar_lea.hbm %s3920_s6, 32  ;;  %p2114_p11 = scmp.lt.u32.totalorder %s2856_s7, %s3920_s6 }
  0xfb   : > { %p2111_p12 = pnand %p2109_p9, %p2715_p3  ;;  %p2115_p13 = scmp.lt.u32.totalorder %s2113_s30, %s2108_s8 }
  0xfc   : > { %p2117_p8 = scmp.lt.u32.totalorder %s2108_s8, %s2856_s7 }
  0xfd   : > { %p3922_p7 = scmp.ne.s32.totalorder %s3921_s15, 0  ;;  %p2112_p6 = pneg %p2111_p12 }
  0xfe   : > { %p2116_p5 = por %p2115_p13, %p2114_p11 }
  0xff   : > { %1689 = dma.hbm_to_vmem [thread:$0]  (!%p3922_p7), %s2823_s24, 16, %s436_s10, %s3923_s20  }
 0x100   : > { %p2118_p4 = por %p2117_p8, %p2116_p5 }
 0x102   : > { %p2119_p2 = pnand %p2118_p4, %p2112_p6 }
 0x104   : > { %2122 = shalt.err (!%p2119_p2)
}
 0x105   : > { %s2123_s0 = scalar_lea.vmem %s470_s11, 16  ;;  %s2371_s24 = smov [#allocation14]  }
 0x106   : > { %p2124_p10 = scmp.ne.s32.totalorder %s470_s11, %s2123_s0  ;;  %s2128_s10 = sshll.u32 %s2371_s24, 4  ;;  %s2129_s10 = int_to_ptr.vmem [resolvable:$false] %s2128_s10 }
 0x107   : > { %s2130_s29 = scalar_lea.vmem %s2129_s10, 32  ;;  %p2131_p9 = scmp.lt.s32.totalorder %s470_s11, %s2129_s10 }
 0x108   : > { %p2126_p0 = pnand %p2124_p10, %p2715_p3  ;;  %p2132_p12 = scmp.lt.s32.totalorder %s2130_s29, %s2123_s0 }
 0x10a   : > { %p2127_p1 = pneg %p2126_p0  ;;  %p2133_p7 = por %p2132_p12, %p2131_p9 }
 0x10c   : > { %p2134_p11 = pnand %p2133_p7, %p2127_p1 }
 0x10e   : > { %2137 = shalt.err (!%p2134_p11)
}
 0x10f   : > { %p3924_p13 = scmp.ne.s32.totalorder %s3921_s15, 0  ;;  %s3925_s1 = scalar_lea.sflag [#allocation13], %s2511_s26 }
 0x110   : > { %s3926_s21 = sld [smem:[#allocation36_spill]] }
 0x111   : > { %1695 = dma.hbm_to_vmem [thread:$0]  (!%p3924_p13), %s2856_s7, 16, %s470_s11, %s3925_s1  }
 0x116   : > { %p3927_p6 = scmp.ne.s32.totalorder %s3926_s21, 0 }
 0x118   : > { %478 = sbr.rel (%p3927_p6) target bundleno = 985 (0x3d9), region = 48 }
 0x11f   : > { %s3928_s4 = sld [smem:[#allocation31_spill]] }
 0x120   : > { %s3929_s28 = sld [smem:[#allocation30_spill]] }
 0x125   : > { %s480_s25 = sand.u32 1, %s3928_s4  }
 0x126   : > { %s2900_s23 = sshll.u32 %s480_s25, 3  ;;  %s481_s16 = scalar_lea.sflag [#allocation4], %s480_s25 }
 0x127   : > { %s484_s20 = scalar_lea.vmem [#allocation3], %s2900_s23  ;;  %p3930_p3 = scmp.ne.s32.totalorder %s3929_s28, 0 }
 0x129   : > { %2279 = dma.done.wait (%p3930_p3), %s481_s16, 128  }
 0x12a   : > { %2281 = vsyncadd (%p3930_p3), %s481_s16, 4294967168  ;;  %s3931_s15 = sld [smem:[#allocation37_spill]]  ;;  %s3932_s26 = sld [smem:[#allocation29_spill]] }
 0x12b   : > { %s3933_s7 = sld [smem:[#allocation38_spill]] }
 0x130   : > { %s2908_s12 = sand.u32 1, %s3931_s15   ;;  %s491_s11 = sand.u32 1, %s3932_s26  }
 0x131   : > { %s1545_s8 = sshll.u32 %s491_s11, 7  ;;  %s490_s18 = scalar_lea.sflag [#allocation7], %s2908_s12 }
 0x132   : > { %s2914_s27 = scalar_lea.vmem [#allocation6], %s1545_s8  ;;  %p3934_p7 = scmp.ne.s32.totalorder %s3933_s7, 0 }
 0x134   : > { %2283 = dma.done.wait (%p3934_p7), %s490_s18, 4096  }
 0x135   : > { %2285 = vsyncadd (%p3934_p7), %s490_s18, 4294963200  ;;  %s2920_s30 = scalar_lea.vmem [#allocation8], %s1545_s8  ;;  %s508_s5 = scalar_lea.sflag [#allocation10], %s2908_s12 }
 0x136   : > { %s2923_s19 = scalar_lea.vmem [#allocation9], %s1545_s8 }
 0x137   : > { %2287 = dma.done.wait (%p3934_p7), %s508_s5, 2048  }
 0x138   : > { %2289 = vsyncadd (%p3934_p7), %s508_s5, 4294965248  ;;  %s3935_s0 = sld [smem:[#allocation27_spill]]  ;;  %s3936_s24 = sld [smem:[#allocation40_spill]] }
 0x13e   : > { %s2930_s10 = sand.u32 1, %s3935_s0   ;;  %p3937_p5 = scmp.ne.s32.totalorder %s3936_s24, 0 }
 0x13f   : > { %s519_s29 = scalar_lea.vmem [#allocation11], %s2930_s10 }
 0x140   : > { %2291 = dma.done.wait (%p3937_p5), %s508_s5, 16  }
 0x141   : > { %2293 = vsyncadd (%p3937_p5), %s508_s5, 4294967280  ;;  %s525_s1 = scalar_lea.sflag [#allocation13], %s2908_s12  ;;  %s527_s21 = scalar_lea.vmem [#allocation12], %s2930_s10 }
 0x142   : > { %2295 = dma.done.wait (%p3937_p5), %s525_s1, 32  }
 0x143   : > { %2297 = vsyncadd (%p3937_p5), %s525_s1, 4294967264  ;;  %v2943_v0 = vld [vmem:[%s527_s21] sm:$0x1]  ;;  %v2947_v2 = vld [vmem:[%s2920_s30] sm:$0xff]  ;;  %s535_s4 = scalar_lea.vmem [#allocation14], %s2930_s10  ;;  %vm3822_vm2 = vcmask 1040384  }
 0x144   : > { %3938 = vst [vmem:[#allocation49_spill] sm:$0xff] %v2943_v0  ;;  %v1042_v1 = vmul.f32 1.442695, %v2943_v0  ;;  %v2950_v3 = vld [vmem:[%s2920_s30 + $0x8] sm:$0xff]  ;;  %v2953_v4 = vld [vmem:[%s2920_s30 + $0x10] sm:$0xff]  ;;  %v2958_v6 = vld [vmem:[%s2920_s30 + $0x18] sm:$0xff] }
 0x145   : > { %v972_v5 = vadd.f32 %v2950_v3, %v2947_v2  ;;  %v2961_v7 = vld [vmem:[%s2920_s30 + $0x20] sm:$0xff]  ;;  %v660_v8 = vmul.f32 1.442695, %v2950_v3  ;;  %v2965_v9 = vld [vmem:[%s2920_s30 + $0x28] sm:$0xff]  ;;  %v662_v10 = vmul.f32 1.442695, %v2953_v4 }
 0x146   : > { %1826 = vpow2.f32 %v1042_v1  ;;  %v664_v11 = vmul.f32 1.442695, %v2958_v6  ;;  %v2971_v13 = vld [vmem:[%s2920_s30 + $0x30] sm:$0xff]  ;;  %v666_v14 = vmul.f32 1.442695, %v2961_v7  ;;  %v2976_v16 = vld [vmem:[%s2920_s30 + $0x38] sm:$0xff] }
 0x147   : > { %v973_v12 = vadd.f32 %v972_v5, %v2953_v4  ;;  %3939 = vst [vmem:[#allocation50_spill] sm:$0xff] %v2971_v13  ;;  %1828 = vpow2.f32 %v660_v8  ;;  %v668_v15 = vmul.f32 1.442695, %v2965_v9  ;;  %3940 = vst [vmem:[#allocation51_spill] sm:$0xff] %v2976_v16  ;;  %v2981_v18 = vld [vmem:[%s2920_s30 + $0x40] sm:$0xff]  ;;  %v2987_v22 = vld [vmem:[%s2920_s30 + $0x48] sm:$0xff] }
 0x148   : > { %1830 = vpow2.f32 %v662_v10  ;;  %3942 = vst [vmem:[#allocation53_spill] sm:$0xff] %v2981_v18  ;;  %v670_v19 = vmul.f32 1.442695, %v2971_v13  ;;  %3943 = vst [vmem:[#allocation54_spill] sm:$0xff] %v2987_v22  ;;  %v2990_v23 = vld [vmem:[%s2920_s30 + $0x50] sm:$0xff]  ;;  %v2997_v28 = vld [vmem:[%s2920_s30 + $0x58] sm:$0xff] }
 0x149   : > { %1832 = vpow2.f32 %v664_v11  ;;  %v974_v20 = vadd.f32 %v973_v12, %v2958_v6  ;;  %v672_v24 = vmul.f32 1.442695, %v2976_v16  ;;  %v674_v26 = vmul.f32 1.442695, %v2981_v18  ;;  %3944 = vst [vmem:[#allocation55_spill] sm:$0xff] %v2997_v28  ;;  %v3002_v31 = vld [vmem:[%s2920_s30 + $0x60] sm:$0xff] }
 0x14a   : > { %1834 = vpow2.f32 %v666_v14  ;;  %v676_v29 = vmul.f32 1.442695, %v2987_v22  ;;  %v678_v32 = vmul.f32 1.442695, %v2990_v23  ;;  %v3006_v33 = vld [vmem:[%s2920_s30 + $0x68] sm:$0xff]  ;;  %v3011_v36 = vld [vmem:[%s2920_s30 + $0x70] sm:$0xff] }
 0x14b   : > { %1836 = vpow2.f32 %v668_v15  ;;  %v975_v25 = vadd.f32 %v974_v20, %v2961_v7  ;;  %v658_v35 = vmul.f32 1.442695, %v2947_v2  ;;  %3945 = vst [vmem:[#allocation56_spill] sm:$0xff] %v3011_v36  ;;  %v680_v37 = vmul.f32 1.442695, %v2997_v28  ;;  %v3017_v40 = vld [vmem:[%s2920_s30 + $0x78] sm:$0xff] }
 0x14c   : > { %3946 = vst [vmem:[#allocation57_spill] sm:$0xff] %v3017_v40  ;;  %v682_v41 = vmul.f32 1.442695, %v3002_v31  ;;  %v684_v45 = vmul.f32 1.442695, %v3006_v33  ;;  %vm1044_vm0 = vcmp.gt.f32.partialorder %v2943_v0, 20.0 }
 0x14d   : > { %v976_v30 = vadd.f32 %v975_v25, %v2965_v9  ;;  %v686_v47 = vmul.f32 1.442695, %v3011_v36  ;;  %v688_v50 = vmul.f32 1.442695, %v3017_v40  ;;  %v1041_v62 = vld [vmem:[%s535_s4] sm:$0x1] }
 0x14e   : > { %v1039_v14 = vld [vmem:[%s519_s29] sm:$0x1]  ;;  %vm691_vm11 = vcmp.gt.f32.partialorder %v2950_v3, 20.0  ;;  %vm690_vm12 = vcmp.gt.f32.partialorder %v2947_v2, 20.0  ;;  %vm702_vm14 = vcmp.gt.f32.partialorder %v3002_v31, 20.0  ;;  %vm703_vm15 = vcmp.gt.f32.partialorder %v3006_v33, 20.0 }
 0x14f   : > { %v977_v34 = vadd.f32 %v976_v30, %v2971_v13  ;;  %s1548_s28 = sshll.u32 %s2930_s10, 3  ;;  %s4031_s25 = sld [smem:[#allocation32_spill]] }
 0x150   : > { %v2978_v17 = vpop.eup %1826  ;;  %s3562_s29 = sshll.u32 %s491_s11, 3 }
 0x151   : > { %3941 = vst [vmem:[#allocation52_spill] sm:$0xff] %v2978_v17  ;;  %v1045_v21 = vadd.f32 1.0, %v2978_v17  ;;  %v1048_v27 = vmul.f32 -0.5, %v2978_v17  ;;  %v3014_v38 = vpop.eup %1828  ;;  %v978_v42 = vadd.f32 %v977_v34, %v2976_v16  ;;  %v1051_v44 = vand.u32 2147483647, %v2978_v17  ;;  %s3840_s11 = scalar_lea.vmem [#allocation18], %s3562_s29 }
 0x152   : > { %v3021_v43 = vpop.eup %1830  ;;  %v715_v54 = vadd.f32 1.0, %v3014_v38  ;;  %v718_v63 = vmul.f32 -0.5, %v3014_v38 }
 0x153   : > { %1838 = vlog2.f32 %v1045_v21  ;;  %v1049_v39 = vadd.f32 1.0, %v1048_v27  ;;  %3947 = vst [vmem:[#allocation58_spill] sm:$0xff] %v3021_v43  ;;  %v3025_v46 = vpop.eup %1832  ;;  %v979_v48 = vadd.f32 %v978_v42, %v2981_v18  ;;  %vm3038_vm1 = vcmp.lt.f32.partialorder %v1051_v44, 0.0004427343 }
 0x154   : > { %1840 = vpow2.f32 %v670_v19  ;;  %3948 = vst [vmem:[#allocation59_spill] sm:$0xff] %v3025_v46  ;;  %v3029_v49 = vpop.eup %1834  ;;  %v724_v57 = vadd.f32 1.0, %v3021_v43  ;;  %v733_v61 = vadd.f32 1.0, %v3025_v46  ;;  %v727_v19 = vmul.f32 -0.5, %v3021_v43 }
 0x155   : > { %1842 = vpow2.f32 %v672_v24  ;;  %3949 = vst [vmem:[#allocation60_spill] sm:$0xff] %v3029_v49  ;;  %v3032_v51 = vpop.eup %1836  ;;  %v1050_v52 = vmul.f32 %v2978_v17, %v1049_v39  ;;  %v980_v53 = vadd.f32 %v979_v48, %v2987_v22  ;;  %v742_v1 = vadd.f32 1.0, %v3029_v49  ;;  %p1097_p8 = scmp.eq.s32.totalorder %s4031_s25, 0  ;;  %p1551_p4 = scmp.ne.s32.totalorder %s4031_s25, 0 }
 0x156   : > { %1844 = vpow2.f32 %v674_v26  ;;  %3950 = vst [vmem:[#allocation61_spill] sm:$0xff] %v3032_v51  ;;  %v751_v11 = vadd.f32 1.0, %v3032_v51  ;;  %v721_v27 = vand.u32 2147483647, %v3014_v38  ;;  %v719_v39 = vadd.f32 1.0, %v718_v63 }
 0x157   : > { %1846 = vpow2.f32 %v676_v29  ;;  %v981_v60 = vadd.f32 %v980_v53, %v2990_v23  ;;  %v736_v29 = vmul.f32 -0.5, %v3025_v46  ;;  %v730_v42 = vand.u32 2147483647, %v3021_v43 }
 0x158   : > { %1848 = vpow2.f32 %v678_v32  ;;  %v754_v48 = vmul.f32 -0.5, %v3032_v51  ;;  %vm3106_vm3 = vcmp.lt.f32.partialorder %v721_v27, 0.0004427343 }
 0x159   : > { %1850 = vpow2.f32 %v658_v35  ;;  %v982_v10 = vadd.f32 %v981_v60, %v2997_v28  ;;  %v745_v35 = vmul.f32 -0.5, %v3029_v49  ;;  %vm3113_vm4 = vcmp.lt.f32.partialorder %v730_v42, 0.0004427343 }
 0x15a   : > { %1852 = vpow2.f32 %v680_v37 }
 0x15b   : > { %1854 = vpow2.f32 %v682_v41  ;;  %v983_v25 = vadd.f32 %v982_v10, %v3002_v31  ;;  %v728_v41 = vadd.f32 1.0, %v727_v19  ;;  %v757_v19 = vand.u32 2147483647, %v3032_v51 }
 0x15c   : > { %1856 = vpow2.f32 %v684_v45 }
 0x15d   : > { %v1839_v55 = vpop.eup %1838  ;;  %1858 = vpow2.f32 %v686_v47  ;;  %v984_v34 = vadd.f32 %v983_v25, %v3006_v33  ;;  %v3111_v10 = vmul.f32 %v3021_v43, %v728_v41  ;;  %vm3143_vm7 = vcmp.lt.f32.partialorder %v757_v19, 0.0004427343 }
 0x15e   : > { %v3043_v58 = vpop.eup %1840  ;;  %v1047_v59 = vmul.f32 0.6931472, %v1839_v55  ;;  %1860 = vpow2.f32 %v688_v50  ;;  %v739_v55 = vand.u32 2147483647, %v3025_v46 }
 0x15f   : > { %3953 = vst [vmem:[#allocation62_spill] sm:$0xff] %v3043_v58  ;;  %v3050_v5 = vpop.eup %1842  ;;  %1862 = vlog2.f32 %v715_v54  ;;  %v760_v20 = vadd.f32 1.0, %v3043_v58  ;;  %v985_v47 = vadd.f32 %v984_v34, %v3011_v36  ;;  %v737_v54 = vadd.f32 1.0, %v736_v29 }
 0x160   : > { %3954 = vst [vmem:[#allocation63_spill] sm:$0xff] %v3050_v5  ;;  %v1053_v8 = vsel %vm3038_vm1, %v1050_v52, %v1047_v59  ;;  %v3056_v12 = vpop.eup %1844  ;;  %1864 = vlog2.f32 %v724_v57  ;;  %v769_v50 = vadd.f32 1.0, %v3050_v5  ;;  %v763_v56 = vmul.f32 -0.5, %v3043_v58 }
 0x161   : > { %3955 = vst [vmem:[#allocation64_spill] sm:$0xff] %v3056_v12  ;;  %v1054_v15 = vsel %vm1044_vm0, %v2943_v0, %v1053_v8  ;;  %v3065_v21 = vpop.eup %1846  ;;  %1866 = vlog2.f32 %v733_v61  ;;  %v986_v60 = vadd.f32 %v985_v47, %v3017_v40  ;;  %v746_v61 = vadd.f32 1.0, %v745_v35  ;;  %v645_v8 = vld [vmem:[%s2923_s19 + $0x18] sm:$0xff] }
 0x162   : > { %3956 = vst [vmem:[#allocation65_spill] sm:$0xff] %v3065_v21  ;;  %v3067_v24 = vmul.f32 %v1054_v15, %v1041_v62  ;;  %v3070_v26 = vpop.eup %1848  ;;  %1868 = vlog2.f32 %v742_v1  ;;  %v748_v62 = vand.u32 2147483647, %v3029_v49  ;;  %v3104_v1 = vmul.f32 %v3014_v38, %v719_v39 }
 0x163   : > { %v3074_v30 = vpop.eup %1850  ;;  %1870 = vlog2.f32 %v751_v11  ;;  %987 = vadd.xlane.f32.xlu0 %v986_v60  ;;  %v755_v15 = vadd.f32 1.0, %v754_v48  ;;  %vm3120_vm5 = vcmp.lt.f32.partialorder %v739_v55, 0.0004427343  ;;  %v764_v34 = vadd.f32 1.0, %v763_v56  ;;  %v647_v60 = vld [vmem:[%s2923_s19 + $0x28] sm:$0xff] }
 0x164   : > { %3957 = vst [vmem:[#allocation66_spill] sm:$0xff] %v3067_v24  ;;  %v3077_v32 = vadd.f32 %v3067_v24, %v1039_v14  ;;  %v3081_v37 = vpop.eup %1852  ;;  %1872 = vlog2.f32 %v760_v20  ;;  %v706_v53 = vadd.f32 1.0, %v3074_v30  ;;  %v766_v20 = vand.u32 2147483647, %v3043_v58 }
 0x165   : > { %v3084_v44 = vpop.eup %1854  ;;  %1874 = vlog2.f32 %v769_v50  ;;  %v709_v27 = vmul.f32 -0.5, %v3074_v30  ;;  %v3125_v39 = vmul.f32 %v3025_v46, %v737_v54  ;;  %v3128_v41 = vmul.f32 %v3029_v49, %v746_v61 }
 0x166   : > { %3958 = vst [vmem:[#allocation67_spill] sm:$0xff] %v3077_v32  ;;  %v1059_v45 = vmul.f32 %v3077_v32, %v3077_v32  ;;  %v3091_v52 = vpop.eup %1856  ;;  %1876 = vlog2.f32 %v706_v53  ;;  %vm3130_vm6 = vcmp.lt.f32.partialorder %v748_v62, 0.0004427343  ;;  %v712_v48 = vand.u32 2147483647, %v3074_v30 }
 0x167   : > { %v3096_v57 = vpop.eup %1858  ;;  %v772_v53 = vmul.f32 -0.5, %v3050_v5  ;;  %v787_v55 = vadd.f32 1.0, %v3065_v21  ;;  %v3141_v56 = vmul.f32 %v3032_v51, %v755_v15  ;;  %vm3147_vm8 = vcmp.lt.f32.partialorder %v766_v20, 0.0004427343 }
 0x168   : > { %v1061_v59 = vsel %vm3822_vm2, %v1059_v45, 0.0  ;;  %v3101_v63 = vpop.eup %1860  ;;  %v778_v45 = vadd.f32 1.0, %v3056_v12  ;;  %v796_v61 = vadd.f32 1.0, %v3070_v26  ;;  %v3153_v32 = vmul.f32 %v3043_v58, %v764_v34 }
 0x169   : > { %1062 = vadd.xlane.f32.xlu1 %v1061_v59  ;;  %v1863_v14 = vpop.eup %1862  ;;  %v781_v0 = vmul.f32 -0.5, %v3056_v12  ;;  %v805_v15 = vadd.f32 1.0, %v3081_v37  ;;  %vm3163_vm9 = vcmp.lt.f32.partialorder %v712_v48, 0.0004427343  ;;  %v773_v34 = vadd.f32 1.0, %v772_v53  ;;  %v4005_v59 = vld [vmem:[#allocation51_spill] sm:$0xff] }
 0x16a   : > { %v1865_v25 = vpop.eup %1864  ;;  %v3136_v50 = vmul.f32 0.6931472, %v1863_v14  ;;  %v710_v14 = vadd.f32 1.0, %v709_v27  ;;  %3971 = vst [vmem:[#allocation68_spill] sm:$0xff] %v3153_v32  ;;  %1878 = vlog2.f32 %v778_v45  ;;  %v775_v40 = vand.u32 2147483647, %v3050_v5 }
 0x16b   : > { %v1867_v35 = vpop.eup %1866  ;;  %v3157_v24 = vmul.f32 0.6931472, %v1865_v25  ;;  %1880 = vlog2.f32 %v787_v55  ;;  %v782_v48 = vadd.f32 1.0, %v781_v0  ;;  %v784_v36 = vand.u32 2147483647, %v3056_v12 }
 0x16c   : > { %v1869_v47 = vpop.eup %1868  ;;  %v3159_v19 = vmul.f32 0.6931472, %v1867_v35  ;;  %1882 = vlog2.f32 %v796_v61  ;;  %v3178_v45 = vmul.f32 %v3074_v30, %v710_v14  ;;  %v814_v0 = vadd.f32 1.0, %v3084_v44 }
 0x16d   : > { %v1871_v54 = vpop.eup %1870  ;;  %v3161_v17 = vmul.f32 0.6931472, %v1869_v47  ;;  %v790_v47 = vmul.f32 -0.5, %v3065_v21  ;;  %1884 = vlog2.f32 %v805_v15  ;;  %v793_v14 = vand.u32 2147483647, %v3065_v21 }
 0x16e   : > { %v1873_v62 = vpop.eup %1872  ;;  %v3172_v25 = vmul.f32 0.6931472, %v1871_v54  ;;  %v799_v15 = vmul.f32 -0.5, %v3070_v26  ;;  %v823_v53 = vadd.f32 1.0, %v3091_v52  ;;  %vm3208_vm10 = vcmp.lt.f32.partialorder %v775_v40, 0.0004427343 }
 0x16f   : > { %v3174_v35 = vmul.f32 0.6931472, %v1873_v62  ;;  %v1875_v58 = vpop.eup %1874  ;;  %v3195_v62 = vmul.f32 %v3050_v5, %v773_v34  ;;  %v791_v34 = vadd.f32 1.0, %v790_v47  ;;  %v3217_v51 = vmul.f32 %v3056_v12, %v782_v48 }
 0x170   : > { %v1877_v61 = vpop.eup %1876  ;;  %v3214_v5 = vmul.f32 0.6931472, %v1875_v58  ;;  %vm3219_vm13 = vcmp.lt.f32.partialorder %v784_v36, 0.0004427343  ;;  %v808_v54 = vmul.f32 -0.5, %v3081_v37  ;;  %1886 = vlog2.f32 %v814_v0 }
 0x171   : > { %3974 = vst [vmem:[#allocation69_spill] sm:$0xff] %v3174_v35  ;;  %v708_v40 = vmul.f32 0.6931472, %v1877_v61  ;;  %v802_v47 = vand.u32 2147483647, %v3070_v26  ;;  %v817_v58 = vmul.f32 -0.5, %v3084_v44  ;;  %1888 = vlog2.f32 %v823_v53 }
 0x172   : > { %vm3230_vm2 = vcmp.lt.f32.partialorder %v793_v14, 0.0004427343  ;;  %v800_v48 = vadd.f32 1.0, %v799_v15  ;;  %v826_v12 = vmul.f32 -0.5, %v3091_v52  ;;  %v3236_v46 = vmul.f32 %v3065_v21, %v791_v34 }
 0x173   : > { %v811_v61 = vand.u32 2147483647, %v3081_v37  ;;  %v832_v0 = vadd.f32 1.0, %v3096_v57  ;;  %v835_v43 = vmul.f32 -0.5, %v3096_v57  ;;  %v777_v53 = vsel %vm3208_vm10, %v3195_v62, %v3214_v5 }
 0x174   : > { %v1879_v49 = vpop.eup %1878  ;;  %v809_v14 = vadd.f32 1.0, %v808_v54  ;;  %v820_v15 = vand.u32 2147483647, %v3084_v44  ;;  %v829_v34 = vand.u32 2147483647, %v3091_v52  ;;  %v714_v13 = vsel %vm3163_vm9, %v3178_v45, %v708_v40  ;;  %v4010_v45 = vld [vmem:[#allocation54_spill] sm:$0xff] }
 0x175   : > { %v1881_v35 = vpop.eup %1880  ;;  %vm3254_vm0 = vcmp.lt.f32.partialorder %v802_v47, 0.0004427343  ;;  %v818_v27 = vadd.f32 1.0, %v817_v58  ;;  %v844_v5 = vmul.f32 -0.5, %v3101_v63  ;;  %v780_v62 = vmul.f32 0.6931472, %v1879_v49 }
 0x176   : > { %v1883_v21 = vpop.eup %1882  ;;  %v801_v18 = vmul.f32 %v3070_v26, %v800_v48  ;;  %v827_v22 = vadd.f32 1.0, %v826_v12  ;;  %v841_v32 = vadd.f32 1.0, %v3101_v63  ;;  %v789_v20 = vmul.f32 0.6931472, %v1881_v35 }
 0x177   : > { %v1885_v54 = vpop.eup %1884  ;;  %vm3263_vm9 = vcmp.lt.f32.partialorder %v811_v61, 0.0004427343  ;;  %1890 = vlog2.f32 %v832_v0  ;;  %v836_v40 = vadd.f32 1.0, %v835_v43  ;;  %v798_v47 = vmul.f32 0.6931472, %v1883_v21 }
 0x178   : > { %v810_v58 = vmul.f32 %v3081_v37, %v809_v14  ;;  %vm3268_vm10 = vcmp.lt.f32.partialorder %v820_v15, 0.0004427343  ;;  %vm3272_vm1 = vcmp.lt.f32.partialorder %v829_v34, 0.0004427343  ;;  %v807_v12 = vmul.f32 0.6931472, %v1885_v54 }
 0x179   : > { %v3277_v35 = vmul.f32 %v3084_v44, %v818_v27  ;;  %v838_v48 = vand.u32 2147483647, %v3096_v57  ;;  %v845_v43 = vadd.f32 1.0, %v844_v5  ;;  %v786_v21 = vsel %vm3219_vm13, %v3217_v51, %v780_v62  ;;  %v642_v15 = vld [vmem:[%s2923_s19] sm:$0xff]  ;;  %v643_v34 = vld [vmem:[%s2923_s19 + $0x8] sm:$0xff]  ;;  %v4001_v42 = vld [vmem:[#allocation69_spill] sm:$0xff] }
 0x17a   : > { %v3285_v61 = vmul.f32 %v3091_v52, %v827_v22  ;;  %1892 = vlog2.f32 %v841_v32  ;;  %v847_v0 = vand.u32 2147483647, %v3101_v63  ;;  %v1887_v14 = vpop.eup %1886  ;;  %v795_v27 = vsel %vm3230_vm2, %v3236_v46, %v789_v20  ;;  %v646_v54 = vld [vmem:[%s2923_s19 + $0x20] sm:$0xff]  ;;  %v4008_v62 = vld [vmem:[#allocation53_spill] sm:$0xff] }
 0x17b   : > { %v3295_v55 = vmul.f32 %v3096_v57, %v836_v40  ;;  %v850_v22 = vsel %vm690_vm12, %v2947_v2, %v714_v13  ;;  %v3989_v51 = vsel %vm3106_vm3, %v3104_v1, %v3136_v50  ;;  %v1889_v5 = vpop.eup %1888  ;;  %v804_v46 = vsel %vm3254_vm0, %v801_v18, %v798_v47 }
 0x17c   : > { %v851_v32 = vsel %vm691_vm11, %v2950_v3, %v3989_v51  ;;  %v3990_v36 = vsel %vm3113_vm4, %v3111_v10, %v3157_v24  ;;  %vm3991_vm2 = vcmp.gt.f32.partialorder %v2953_v4, 20.0  ;;  %v3992_v13 = vsel %vm3120_vm5, %v3125_v39, %v3159_v19  ;;  %v4007_v19 = vld [vmem:[#allocation58_spill] sm:$0xff] }
 0x17d   : > { %v852_v2 = vsel %vm3991_vm2, %v2953_v4, %v3990_v36  ;;  %vm3993_vm3 = vcmp.gt.f32.partialorder %v2958_v6, 20.0  ;;  %v3994_v16 = vsel %vm3130_vm6, %v3128_v41, %v3161_v17  ;;  %vm3995_vm4 = vcmp.gt.f32.partialorder %v2961_v7, 20.0  ;;  %v644_v4 = vld [vmem:[%s2923_s19 + $0x10] sm:$0xff]  ;;  %v651_v36 = vld [vmem:[%s2923_s19 + $0x48] sm:$0xff] }
 0x17e   : > { %v853_v3 = vsel %vm3993_vm3, %v2958_v6, %v3992_v13  ;;  %v854_v18 = vsel %vm3995_vm4, %v2961_v7, %v3994_v16  ;;  %v813_v24 = vsel %vm3263_vm9, %v810_v58, %v807_v12  ;;  %vm3337_vm5 = vcmp.lt.f32.partialorder %v838_v48, 0.0004427343  ;;  %v4000_v41 = vld [vmem:[#allocation68_spill] sm:$0xff]  ;;  %v4018_v16 = vld [vmem:[#allocation62_spill] sm:$0xff] }
 0x17f   : > { %v3342_v6 = vmul.f32 %v3101_v63, %v845_v43  ;;  %v3998_v7 = vsel %vm3143_vm7, %v3141_v56, %v3172_v25  ;;  %vm3999_vm6 = vcmp.gt.f32.partialorder %v2965_v9, 20.0  ;;  %1894 = vrcp.f32 %v3074_v30  ;;  %v4003_v56 = vld [vmem:[#allocation50_spill] sm:$0xff]  ;;  %v648_v12 = vld [vmem:[%s2923_s19 + $0x30] sm:$0xff]  ;;  %v4014_v43 = vld [vmem:[#allocation55_spill] sm:$0xff] }
 0x180   : > { %v855_v17 = vsel %vm3999_vm6, %v2965_v9, %v3998_v7  ;;  %v816_v10 = vmul.f32 0.6931472, %v1887_v14  ;;  %v866_v11 = vmul.f32 %v850_v22, %v642_v15  ;;  %v3354_v29 = vmul.f32 %v851_v32, %v643_v34  ;;  %v610_v25 = vld [vmem:[%s2914_s27] sm:$0xff]  ;;  %v612_v34 = vld [vmem:[%s2914_s27 + $0x10] sm:$0xff] }
 0x181   : > { %1896 = vrcp.f32 %v3014_v38  ;;  %v825_v39 = vmul.f32 0.6931472, %v1889_v5  ;;  %v4002_v50 = vsel %vm3147_vm8, %v4000_v41, %v4001_v42  ;;  %vm4004_vm7 = vcmp.gt.f32.partialorder %v4003_v56, 20.0  ;;  %v611_v38 = vld [vmem:[%s2914_s27 + $0x8] sm:$0xff]  ;;  %v1891_v58 = vpop.eup %1890  ;;  %v650_v22 = vld [vmem:[%s2923_s19 + $0x40] sm:$0xff]  ;;  %v4017_v32 = vld [vmem:[#allocation61_spill] sm:$0xff] }
 0x182   : > { %v856_v9 = vsel %vm4004_vm7, %v4003_v56, %v4002_v50  ;;  %vm4006_vm11 = vcmp.gt.f32.partialorder %v4005_v59, 20.0  ;;  %1898 = vrcp.f32 %v4007_v19  ;;  %vm4009_vm8 = vcmp.gt.f32.partialorder %v4008_v62, 20.0  ;;  %v4021_v50 = vld [vmem:[#allocation64_spill] sm:$0xff] }
 0x183   : > { %v857_v30 = vsel %vm4006_vm11, %v4005_v59, %v777_v53  ;;  %v858_v20 = vsel %vm4009_vm8, %v4008_v62, %v786_v21  ;;  %vm4011_vm12 = vcmp.gt.f32.partialorder %v4010_v45, 20.0  ;;  %v868_v47 = vmul.f32 %v852_v2, %v644_v4  ;;  %v4012_v53 = vld [vmem:[#allocation59_spill] sm:$0xff]  ;;  %v4016_v21 = vld [vmem:[#allocation60_spill] sm:$0xff]  ;;  %v653_v4 = vld [vmem:[%s2923_s19 + $0x58] sm:$0xff] }
 0x184   : > { %v859_v40 = vsel %vm4011_vm12, %v4010_v45, %v795_v27  ;;  %1900 = vrcp.f32 %v4012_v53  ;;  %vm4013_vm13 = vcmp.gt.f32.partialorder %v2990_v23, 20.0  ;;  %vm4015_vm0 = vcmp.gt.f32.partialorder %v4014_v43, 20.0  ;;  %v649_v27 = vld [vmem:[%s2923_s19 + $0x38] sm:$0xff]  ;;  %v1893_v28 = vpop.eup %1892  ;;  %v615_v56 = vld [vmem:[%s2914_s27 + $0x28] sm:$0xff]  ;;  %v616_v45 = vld [vmem:[%s2914_s27 + $0x30] sm:$0xff] }
 0x185   : > { %v860_v48 = vsel %vm4013_vm13, %v2990_v23, %v804_v46  ;;  %v861_v14 = vsel %vm4015_vm0, %v4014_v43, %v813_v24  ;;  %v869_v15 = vmul.f32 %v853_v3, %v645_v8  ;;  %1902 = vrcp.f32 %v4016_v21  ;;  %v613_v23 = vld [vmem:[%s2914_s27 + $0x18] sm:$0xff]  ;;  %v4019_v8 = vld [vmem:[#allocation63_spill] sm:$0xff] }
 0x186   : > { %v822_v51 = vsel %vm3268_vm10, %v3277_v35, %v816_v10  ;;  %1904 = vrcp.f32 %v4017_v32  ;;  %v3396_v5 = vadd.f32 %v866_v11, %v610_v25  ;;  %v3399_v46 = vadd.f32 %v3354_v29, %v611_v38  ;;  %v652_v35 = vld [vmem:[%s2923_s19 + $0x50] sm:$0xff]  ;;  %v614_v10 = vld [vmem:[%s2914_s27 + $0x20] sm:$0xff] }
 0x187   : > { %v831_v2 = vsel %vm3272_vm1, %v3285_v61, %v825_v39  ;;  %v870_v13 = vmul.f32 %v854_v18, %v646_v54  ;;  %v871_v3 = vmul.f32 %v855_v17, %v647_v60  ;;  %1906 = vrcp.f32 %v4018_v16  ;;  %v4020_v39 = vld [vmem:[#allocation56_spill] sm:$0xff]  ;;  %v4024_v62 = vld [vmem:[#allocation65_spill] sm:$0xff] }
 0x188   : > { %v3408_v24 = vmul.f32 0.6931472, %v1891_v58  ;;  %v872_v7 = vmul.f32 %v856_v9, %v648_v12  ;;  %1908 = vrcp.f32 %v4019_v8  ;;  %v3412_v41 = vadd.f32 %v868_v47, %v612_v34  ;;  %v4025_v21 = vld [vmem:[#allocation57_spill] sm:$0xff] }
 0x189   : > { %v862_v49 = vsel %vm702_vm14, %v3002_v31, %v822_v51  ;;  %v3417_v61 = vmul.f32 %v857_v30, %v649_v27  ;;  %v3419_v18 = vmul.f32 %v858_v20, %v650_v22  ;;  %v3421_v17 = vadd.f32 %v869_v15, %v613_v23  ;;  %v1895_v59 = vpop.eup %1894  ;;  %v617_v22 = vld [vmem:[%s2914_s27 + $0x38] sm:$0xff]  ;;  %v654_v23 = vld [vmem:[%s2923_s19 + $0x60] sm:$0xff] }
 0x18a   : > { %vm704_vm1 = vcmp.gt.f32.partialorder %v4020_v39, 20.0  ;;  %v3427_v42 = vsel %vm703_vm15, %v3006_v33, %v831_v2  ;;  %1910 = vrcp.f32 %v4021_v50  ;;  %v930_v31 = vmul.f32 %v3396_v5, %v3396_v5 }
 0x18b   : > { %v931_v9 = vmul.f32 %v3399_v46, %v3399_v46  ;;  %v3435_v30 = vmul.f32 %v859_v40, %v651_v36  ;;  %v3437_v19 = vmul.f32 %v860_v48, %v652_v35  ;;  %v3439_v25 = vmul.f32 %v861_v14, %v653_v4  ;;  %v1897_v33 = vpop.eup %1896  ;;  %v4026_v4 = vld [vmem:[#allocation52_spill] sm:$0xff] }
 0x18c   : > { %v3441_v38 = vadd.f32 %v870_v13, %v614_v10  ;;  %v840_v54 = vsel %vm3337_vm5, %v3295_v55, %v3408_v24  ;;  %vm3449_vm14 = vcmp.lt.f32.partialorder %v847_v0, 0.0004427343  ;;  %1912 = vrcp.f32 %v4024_v62  ;;  %v1899_v53 = vpop.eup %1898 }
 0x18d   : > { %v914_v20 = vmul.f32 %v1895_v59, %v866_v11  ;;  %v932_v40 = vmul.f32 %v3412_v41, %v3412_v41  ;;  %v3457_v58 = vmul.f32 0.6931472, %v1893_v28  ;;  %v915_v1 = vmul.f32 %v1897_v33, %v3354_v29 }
 0x18e   : > { %v3460_v55 = vadd.f32 %v871_v3, %v615_v56  ;;  %v933_v0 = vmul.f32 %v3421_v17, %v3421_v17  ;;  %v1901_v12 = vpop.eup %1900  ;;  %1914 = vrcp.f32 %v3070_v26  ;;  %v916_v11 = vmul.f32 %v1899_v53, %v868_v47 }
 0x18f   : > { %v997_v48 = vmul.f32 %v914_v20, %v914_v20  ;;  %v946_v43 = vadd.f32 %v931_v9, %v930_v31  ;;  %v1903_v14 = vpop.eup %1902  ;;  %vm705_vm15 = vcmp.gt.f32.partialorder %v4025_v21, 20.0  ;;  %v917_v34 = vmul.f32 %v1901_v12, %v869_v15  ;;  %v618_v15 = vld [vmem:[%s2914_s27 + $0x40] sm:$0xff]  ;;  %v619_v31 = vld [vmem:[%s2914_s27 + $0x48] sm:$0xff] }
 0x190   : > { %v998_v27 = vmul.f32 %v915_v1, %v915_v1  ;;  %v3467_v29 = vadd.f32 %v872_v7, %v616_v45  ;;  %v934_v51 = vmul.f32 %v3441_v38, %v3441_v38  ;;  %v1905_v32 = vpop.eup %1904  ;;  %1916 = vrcp.f32 %v3081_v37  ;;  %v620_v45 = vld [vmem:[%s2914_s27 + $0x50] sm:$0xff] }
 0x191   : > { %v918_v26 = vmul.f32 %v1903_v14, %v870_v13  ;;  %v999_v47 = vmul.f32 %v916_v11, %v916_v11  ;;  %v947_v36 = vadd.f32 %v946_v43, %v932_v40  ;;  %v1907_v2 = vpop.eup %1906  ;;  %v919_v16 = vmul.f32 %v1905_v32, %v871_v3  ;;  %v621_v11 = vld [vmem:[%s2914_s27 + $0x58] sm:$0xff] }
 0x192   : > { %v1000_v28 = vmul.f32 %v917_v34, %v917_v34  ;;  %v1013_v35 = vadd.f32 %v998_v27, %v997_v48  ;;  %1918 = vrcp.f32 %v4026_v4  ;;  %v1909_v24 = vpop.eup %1908  ;;  %v3477_v8 = vadd.f32 %v3417_v61, %v617_v22  ;;  %v656_v48 = vld [vmem:[%s2923_s19 + $0x70] sm:$0xff]  ;;  %v622_v27 = vld [vmem:[%s2914_s27 + $0x60] sm:$0xff] }
 0x193   : > { %1920 = vrcp.f32 %v3084_v44  ;;  %v935_v37 = vmul.f32 %v3460_v55, %v3460_v55  ;;  %v948_v13 = vadd.f32 %v947_v36, %v933_v0  ;;  %v3481_v10 = vmul.f32 %v862_v49, %v654_v23  ;;  %v4027_v4 = vld [vmem:[#allocation66_spill] sm:$0xff] }
 0x194   : > { %v920_v3 = vmul.f32 %v1907_v2, %v872_v7  ;;  %v1001_v50 = vmul.f32 %v918_v26, %v918_v26  ;;  %v1014_v56 = vadd.f32 %v1013_v35, %v999_v47  ;;  %v1911_v9 = vpop.eup %1910  ;;  %1922 = vrcp.f32 %v3091_v52  ;;  %v655_v52 = vld [vmem:[%s2923_s19 + $0x68] sm:$0xff] }
 0x195   : > { %v3486_v44 = vadd.f32 %v3419_v18, %v618_v15  ;;  %v936_v59 = vmul.f32 %v3467_v29, %v3467_v29  ;;  %v949_v33 = vadd.f32 %v948_v13, %v934_v51  ;;  %v864_v49 = vsel %vm704_vm1, %v4020_v39, %v840_v54  ;;  %v657_v51 = vld [vmem:[%s2923_s19 + $0x78] sm:$0xff] }
 0x196   : > { %v921_v7 = vmul.f32 %v1909_v24, %v3417_v61  ;;  %v1002_v62 = vmul.f32 %v919_v16, %v919_v16  ;;  %v1015_v20 = vadd.f32 %v1014_v56, %v1000_v28  ;;  %v1913_v40 = vpop.eup %1912  ;;  %1924 = vrcp.f32 %v3096_v57  ;;  %v623_v16 = vld [vmem:[%s2914_s27 + $0x68] sm:$0xff] }
 0x197   : > { %v3498_v53 = vadd.f32 %v3435_v30, %v619_v31  ;;  %v937_v1 = vmul.f32 %v3477_v8, %v3477_v8  ;;  %v950_v0 = vadd.f32 %v949_v33, %v935_v37  ;;  %v849_v61 = vsel %vm3449_vm14, %v3342_v6, %v3457_v58 }
 0x198   : > { %v922_v39 = vmul.f32 %v1911_v9, %v3419_v18  ;;  %v1003_v54 = vmul.f32 %v920_v3, %v920_v3  ;;  %v1016_v12 = vadd.f32 %v1015_v20, %v1001_v50  ;;  %v1915_v57 = vpop.eup %1914  ;;  %1926 = vrcp.f32 %v3101_v63  ;;  %v625_v20 = vld [vmem:[%s2914_s27 + $0x78] sm:$0xff] }
 0x199   : > { %v3511_v43 = vadd.f32 %v3437_v19, %v620_v45  ;;  %v938_v14 = vmul.f32 %v3486_v44, %v3486_v44  ;;  %v951_v34 = vadd.f32 %v950_v0, %v936_v59  ;;  %v879_v60 = vmul.f32 %v3427_v42, %v655_v52 }
 0x19a   : > { %v923_v6 = vmul.f32 %v1913_v40, %v3435_v30  ;;  %v1004_v18 = vmul.f32 %v921_v7, %v921_v7  ;;  %v1017_v58 = vadd.f32 %v1016_v12, %v1002_v62  ;;  %v1917_v22 = vpop.eup %1916  ;;  %v865_v63 = vsel %vm705_vm15, %v4025_v21, %v849_v61 }
 0x19b   : > { %v3523_v32 = vadd.f32 %v3439_v25, %v621_v11  ;;  %v939_v23 = vmul.f32 %v3498_v53, %v3498_v53  ;;  %v952_v26 = vadd.f32 %v951_v34, %v937_v1  ;;  %v880_v47 = vmul.f32 %v864_v49, %v656_v48 }
 0x19c   : > { %v1919_v42 = vpop.eup %1918  ;;  %v924_v30 = vmul.f32 %v1915_v57, %v3437_v19  ;;  %v1005_v36 = vmul.f32 %v922_v39, %v922_v39  ;;  %v1018_v2 = vadd.f32 %v1017_v58, %v1003_v54  ;;  %v3530_v35 = vadd.f32 %v3481_v10, %v622_v27  ;;  %v624_v19 = vld [vmem:[%s2914_s27 + $0x70] sm:$0xff] }
 0x19d   : > { %v1921_v28 = vpop.eup %1920  ;;  %v940_v21 = vmul.f32 %v3511_v43, %v3511_v43  ;;  %v953_v15 = vadd.f32 %v952_v26, %v938_v14  ;;  %v1058_v24 = vmul.f32 %v1919_v42, %v4027_v4  ;;  %v881_v37 = vmul.f32 %v865_v63, %v657_v51 }
 0x19e   : > { %v925_v13 = vmul.f32 %v1917_v22, %v3439_v25  ;;  %v1006_v3 = vmul.f32 %v923_v6, %v923_v6  ;;  %v1019_v50 = vadd.f32 %v1018_v2, %v1004_v18  ;;  %v1923_v56 = vpop.eup %1922  ;;  %v3537_v31 = vadd.f32 %v879_v60, %v623_v16  ;;  %v4029_v2 = vld [vmem:[#allocation49_spill] sm:$0xff] }
 0x19f   : > { %v941_v9 = vmul.f32 %v3523_v32, %v3523_v32  ;;  %v954_v59 = vadd.f32 %v953_v15, %v939_v23  ;;  %v1084_v33 = vmul.f32 %v1058_v24, %v1058_v24  ;;  %v926_v49 = vmul.f32 %v1921_v28, %v3481_v10 }
 0x1a0   : > { %v1007_v7 = vmul.f32 %v924_v30, %v924_v30  ;;  %v1020_v62 = vadd.f32 %v1019_v50, %v1005_v36  ;;  %v1925_v45 = vpop.eup %1924  ;;  %v3543_v40 = vadd.f32 %v880_v47, %v624_v19  ;;  %v942_v25 = vmul.f32 %v3530_v35, %v3530_v35 }
 0x1a1   : > { %v955_v52 = vadd.f32 %v954_v59, %v940_v21  ;;  %vm4028_vm10 = vcmask 1040384   ;;  %v927_v0 = vmul.f32 %v1923_v56, %v879_v60  ;;  %v1008_v61 = vmul.f32 %v925_v13, %v925_v13 }
 0x1a2   : > { %v1085_v1 = vsel %vm4028_vm10, %v1084_v33, 0.0  ;;  %v1021_v39 = vadd.f32 %v1020_v62, %v1006_v3  ;;  %v1927_v54 = vpop.eup %1926  ;;  %v3548_v12 = vadd.f32 %v881_v37, %v625_v20  ;;  %v943_v10 = vmul.f32 %v3537_v31, %v3537_v31  ;;  %vm4030_vm9 = vmmov %vm4028_vm10 }
 0x1a3   : > { %v956_v11 = vadd.f32 %v955_v52, %v941_v9  ;;  %v928_v57 = vmul.f32 %v1925_v45, %v880_v47  ;;  %v1009_v48 = vmul.f32 %v926_v49, %v926_v49  ;;  %v944_v34 = vmul.f32 %v3543_v40, %v3543_v40 }
 0x1a4   : > { %v1022_v14 = vadd.f32 %v1021_v39, %v1007_v7  ;;  %v929_v18 = vmul.f32 %v1927_v54, %v881_v37  ;;  %v1010_v58 = vmul.f32 %v927_v0, %v927_v0  ;;  %v945_v60 = vmul.f32 %v3548_v12, %v3548_v12 }
 0x1a5   : > { %v957_v6 = vadd.f32 %v956_v11, %v942_v25  ;;  %v1011_v51 = vmul.f32 %v928_v57, %v928_v57  ;;  %v1073_v16 = vsel %vm4030_vm9, %v4029_v2, 0.0 }
 0x1a6   : > { %v1023_v27 = vadd.f32 %v1022_v14, %v1008_v61  ;;  %v1012_v26 = vmul.f32 %v929_v18, %v929_v18 }
 0x1a7   : > { %v958_v22 = vadd.f32 %v957_v6, %v943_v10 }
 0x1a8   : > { %v1024_v63 = vadd.f32 %v1023_v27, %v1009_v48 }
 0x1a9   : > { %v959_v23 = vadd.f32 %v958_v22, %v944_v34 }
 0x1aa   : > { %v1025_v42 = vadd.f32 %v1024_v63, %v1010_v58 }
 0x1ab   : > { %v960_v47 = vadd.f32 %v959_v23, %v945_v60 }
 0x1ac   : > { %v1026_v30 = vadd.f32 %v1025_v42, %v1011_v51 }
 0x1ad   : > { %961 = vadd.xlane.f32.xlu0 %v960_v47 }
 0x1ae   : > { %v1027_v36 = vadd.f32 %v1026_v30, %v1012_v26  ;;  %v1110_v30 = vlaneseq (!%p1551_p4) }
 0x1b0   : > { %1028 = vadd.xlane.f32.xlu1 %v1027_v36  ;;  %v1111_v36 = vshrl.u32 (!%p1551_p4), %v1110_v30, 7 }
 0x1b1   : > { %1074 = vadd.xlane.f32.xlu0 %v1073_v16  ;;  %v4032_v16 = vld [vmem:[#allocation67_spill] sm:$0xff] (!%p1551_p4) }
 0x1b2   : > { %v1112_v2 = vsub.s32 (!%p1551_p4), 0, %v1111_v36 }
 0x1b4   : > { %1086 = vadd.xlane.f32.xlu1 %v1085_v1 }
 0x1f0   : > { %v988_v28 = vpop.xlane.xlu0 %987 }
 0x1f1   : > { %v989_v15 = vrot.slane %v988_v28, 4 }
 0x1f3   : > { %v990_v24 = vadd.f32 %v989_v15, %v988_v28  ;;  %v1113_v28 = vrot.slane (!%p1551_p4), %v4032_v16, %v1112_v2 }
 0x1f5   : > { %v991_v13 = vrot.slane %v990_v24, 2  ;;  %1115 = vst [vmem:[#allocation2] sm:$0xff] (!%p1551_p4), %v1113_v28 }
 0x1f6   : > { %v1063_v21 = vpop.xlane.xlu1 %1062 }
 0x1f7   : > { %v1064_v4 = vrot.slane %v1063_v21, 4  ;;  %v992_v49 = vadd.f32 %v991_v13, %v990_v24 }
 0x1f9   : > { %v1065_v37 = vadd.f32 %v1064_v4, %v1063_v21  ;;  %v993_v39 = vrot.slane %v992_v49, 1 }
 0x1fb   : > { %v1066_v19 = vrot.slane %v1065_v37, 2  ;;  %v994_v18 = vadd.f32 %v993_v39, %v992_v49 }
 0x1fd   : > { %v1067_v1 = vadd.f32 %v1066_v19, %v1065_v37 }
 0x1ff   : > { %v1068_v34 = vrot.slane %v1067_v1, 1 }
 0x201   : > { %v1069_v51 = vadd.f32 %v1068_v34, %v1067_v1 }
 0x23a   : > { %v962_v3 = vpop.xlane.xlu0 %961 }
 0x23b   : > { %v963_v50 = vrot.slane %v962_v3, 4 }
 0x23d   : > { %v1029_v56 = vpop.xlane.xlu1 %1028  ;;  %v964_v9 = vadd.f32 %v963_v50, %v962_v3 }
 0x23e   : > { %v1030_v59 = vrot.slane %v1029_v56, 4  ;;  %v1075_v33 = vpop.xlane.xlu0 %1074 }
 0x23f   : > { %v965_v7 = vrot.slane %v964_v9, 2  ;;  %v1076_v62 = vrot.slane %v1075_v33, 4 }
 0x240   : > { %v1031_v20 = vadd.f32 %v1030_v59, %v1029_v56 }
 0x241   : > { %v1087_v45 = vpop.xlane.xlu1 %1086  ;;  %v1077_v25 = vadd.f32 %v1076_v62, %v1075_v33  ;;  %v966_v52 = vadd.f32 %v965_v7, %v964_v9 }
 0x242   : > { %v1032_v0 = vrot.slane %v1031_v20, 2  ;;  %v1088_v61 = vrot.slane %v1087_v45, 4 }
 0x243   : > { %v1078_v54 = vrot.slane %v1077_v25, 2  ;;  %v967_v10 = vrot.slane %v966_v52, 1 }
 0x244   : > { %v1089_v11 = vadd.f32 %v1088_v61, %v1087_v45  ;;  %v1033_v57 = vadd.f32 %v1032_v0, %v1031_v20 }
 0x245   : > { %v1079_v48 = vadd.f32 %v1078_v54, %v1077_v25  ;;  %v968_v14 = vadd.f32 %v967_v10, %v966_v52 }
 0x246   : > { %v1090_v6 = vrot.slane %v1089_v11, 2  ;;  %v1034_v58 = vrot.slane %v1033_v57, 1 }
 0x247   : > { %1642 = vpush %v968_v14  ;;  %v1080_v27 = vrot.slane %v1079_v48, 1 }
 0x248   : > { %v1091_v60 = vadd.f32 %v1090_v6, %v1089_v11  ;;  %1644 = vpush %v994_v18  ;;  %v1035_v22 = vadd.f32 %v1034_v58, %v1033_v57 }
 0x249   : > { %v1081_v63 = vadd.f32 %v1080_v27, %v1079_v48 }
 0x24a   : > { %1646 = vpush %v1035_v22  ;;  %v1092_v23 = vrot.slane %v1091_v60, 1 }
 0x24b   : > { %1648 = vpush %v1069_v51 }
 0x24c   : > { %1650 = vpush %v1081_v63  ;;  %v1093_v26 = vadd.f32 %v1092_v23, %v1091_v60 }
 0x24e   : > { %1652 = vpush %v1093_v26 }
 0x278   : > { %s1643_s16 = spop %1642 }
 0x279   : > { %s970_s15 = smul.f32 201.7144, %s1643_s16  ;;  %s1645_s7 = spop %1644 }
 0x27a   : > { %s996_s8 = ssub.f32 -15055.889, %s1645_s7 }
 0x27b   : > { %s971_s18 = ssub.f32 34096.11, %s970_s15  ;;  %s1647_s27 = spop %1646 }
 0x27c   : > { %s1037_s30 = smul.f32 0.5, %s1647_s27  ;;  %s1649_s5 = spop %1648 }
 0x27d   : > { %s1071_s19 = smul.f32 201.7144, %s1649_s5  ;;  %s1651_s0 = spop %1650 }
 0x27e   : > { %s1038_s24 = ssub.f32 %s996_s8, %s1037_s30  ;;  %s599_s8 = scalar_lea.vmem [#allocation16], %s3562_s29 }
 0x27f   : > { %s1072_s1 = ssub.f32 266.37585, %s1071_s19  ;;  %s1653_s21 = spop %1652 }
 0x280   : > { %s1083_s4 = ssub.f32 -117.62413, %s1651_s0  ;;  %s1095_s16 = smul.f32 0.5, %s1653_s21 }
 0x281   : > { %s4077_s1 = smov (!%p1097_p8, %s1072_s1), 0.0  ;;  %s3576_s27 = scalar_lea.vmem [#allocation15], %s1548_s28 }
 0x282   : > { %s1096_s15 = ssub.f32 %s1083_s4, %s1095_s16  ;;  %1108 = sbr.rel (%p1551_p4) target bundleno = 649 (0x289), region = 80 }
 0x283   : > { %s1099_s7 = sadd.f32 %s4077_s1, %s971_s18 }
 0x284   : > { %s4079_s15 = smov (!%p1097_p8, %s1096_s15), 0.0 }
 0x285   : > { %v1102_v42 = vstv %s1099_s7  ;;  %s1101_s26 = sadd.f32 %s4079_s15, %s1038_s24 }
 0x286   : > { %1103 = vst [vmem:[%s599_s8] sm:$0xff] %v1102_v42 }
 0x287   : > { %v1104_v47 = vstv %s1101_s26 }
 0x288   : > { %1105 = vst [vmem:[%s3840_s11] sm:$0xff] %v1104_v47 }
 0x289 PF: > { %v1619_v21 = vpack.c.bf16 %v3399_v46, %v3396_v5  ;;  %v2372_v15 = vmov 0.0|0.0   ;;  %v1622_v4 = vpack.c.bf16 %v3421_v17, %v3412_v41  ;;  %vm2373_vm2 = vmmov 0   ;;  %s4033_s28 = sld [smem:[#allocation32_spill]] }
 0x28a   : > { %1618 = vmatprep.subr.bf16.mxu0 %v2372_v15  ;;  %v2374_v24 = vmov 0.0   ;;  %v1625_v37 = vpack.c.bf16 %v3460_v55, %v3441_v38  ;;  %v1628_v5 = vpack.c.bf16 %v3477_v8, %v3467_v29  ;;  %v1631_v46 = vpack.c.bf16 %v3498_v53, %v3486_v44  ;;  %v1117_v55 = vld [vmem:[%s484_s20] sm:$0xff]  ;;  %v1116_v29 = vld [vmem:[#allocation2] sm:$0xff] }
 0x28b   : > { %1620 = vmatpush3.bf16.msra.mxu0 %v1619_v21  ;;  %1615 = vmatprep.mubr.msk.f32.mxu0 %vm2373_vm2, %v2374_v24  ;;  %v1634_v41 = vpack.c.bf16 %v3523_v32, %v3511_v43  ;;  %v1637_v17 = vpack.c.bf16 %v3537_v31, %v3530_v35  ;;  %v1640_v38 = vpack.c.bf16 %v3548_v12, %v3543_v40 }
 0x28c   : > { %1621 = vmatprep.subr.bf16.mxu0 %v2372_v15 }
 0x28f   : > { %1623 = vmatpush3.bf16.msra.mxu0 %v1622_v4  ;;  %p1552_p2 = scmp.ne.s32.totalorder %s4033_s28, 1 }
 0x290   : > { %1624 = vmatprep.subr.bf16.mxu0 %v2372_v15 }
 0x293   : > { %1626 = vmatpush3.bf16.msra.mxu0 %v1625_v37 }
 0x294   : > { %1627 = vmatprep.subr.bf16.mxu0 %v2372_v15 }
 0x297   : > { %1629 = vmatpush3.bf16.msra.mxu0 %v1628_v5 }
 0x298   : > { %1630 = vmatprep.subr.bf16.mxu0 %v2372_v15 }
 0x29b   : > { %1632 = vmatpush3.bf16.msra.mxu0 %v1631_v46 }
 0x29c   : > { %1633 = vmatprep.subr.bf16.mxu0 %v2372_v15 }
 0x29f   : > { %1635 = vmatpush3.bf16.msra.mxu0 %v1634_v41 }
 0x2a0   : > { %1636 = vmatprep.subr.bf16.mxu0 %v2372_v15 }
 0x2a3   : > { %1638 = vmatpush3.bf16.msra.mxu0 %v1637_v17 }
 0x2a4   : > { %1639 = vmatprep.subr.bf16.mxu0 %v2372_v15 }
 0x2a7   : > { %1641 = vmatpush3.bf16.msra.mxu0 %v1640_v38 }
 0x2aa   : > { %1616 = vmatmul.mubr.f32.vlgmr.msra.gmra.mrb[0].mxu0 %v1117_v55 }
 0x37a   : > { %1193 = sbr.rel (%p1552_p2) target bundleno = 905 (0x389), region = 84 }
 0x37d   : > { %v1184_v8 = vpop.f32.mrb[0].mxu0 }
 0x37e   : > { %v1188_v44 = vadd.f32 %v1184_v8, %v1116_v29  ;;  %v1617_v53 = vpop.f32.mrb[1].mxu0 }
 0x380   : > { %1189 = vst [vmem:[#allocation2] sm:$0xff] %v1188_v44 }
 0x387   : > { %v1194_v43 = vld [vmem:[#allocation2] sm:$0xff] }
 0x388   : > { %1195 = vst [vmem:[%s3576_s27] sm:$0xff] %v1194_v43 }
 0x389 PF: > { %s4034_s25 = sld [smem:[#allocation33_spill]]  ;;  %s4035_s18 = sld [smem:[#allocation32_spill]] }
 0x38a   : > { %s4036_s30 = sld [smem:[#allocation42_spill]]  ;;  %s1235_s5 = sshll.u32 %s599_s8, 4  ;;  %s3607_s5 = int_to_ptr.vmem [resolvable:$true] %s1235_s5 }
 0x38b   : > { %s4037_s1 = sld [smem:[#allocation78_spill]]  ;;  %s1202_s4 = scalar_lea.sflag [#allocation17], %s2908_s12 }
 0x38c   : > { %s2138_s16 = scalar_lea.vmem %s3607_s5, 128  ;;  %s2375_s15 = smov [#allocation16]  }
 0x38d   : > { %p2139_p10 = scmp.ne.s32.totalorder %s3607_s5, %s2138_s16  ;;  %s2142_s7 = sshll.u32 %s2375_s15, 4  ;;  %s2143_s7 = int_to_ptr.vmem [resolvable:$false] %s2142_s7 }
 0x38e   : > { %s2144_s8 = scalar_lea.vmem %s2143_s7, 256  ;;  %p2145_p12 = scmp.lt.s32.totalorder %s3607_s5, %s2143_s7 }
 0x38f   : > { %s1557_s23 = sshll.u32 %s4034_s25, 1  ;;  %p2146_p11 = scmp.lt.s32.totalorder %s2144_s8, %s2138_s16 }
 0x390   : > { %s3602_s20 = sadd.s32 %s4035_s18, %s1557_s23  ;;  %p4038_p0 = scmp.ne.s32.totalorder %s4036_s30, 0 }
 0x391   : > { %s3841_s19 = sshll.u32 %s3602_s20, 7  ;;  %p2147_p13 = por %p2146_p11, %p2145_p12 }
 0x392   : > { %s1233_s21 = scalar_lea.hbm %s4037_s1, %s3841_s19  ;;  %p2140_p1 = pnand %p2139_p10, %p4038_p0 }
 0x394   : > { %p2141_p9 = pneg %p2140_p1 }
 0x396   : > { %p2148_p6 = pnand %p2147_p13, %p2141_p9 }
 0x398   : > { %2151 = shalt.err (!%p2148_p6)
}
 0x399   : > { %s2152_s26 = scalar_lea.hbm %s1233_s21, 128  ;;  %s2156_s23 = scalar_lea.hbm %s4037_s1, 512 }
 0x39a   : > { %p2153_p3 = scmp.ne.s32.totalorder %s1233_s21, %s2152_s26  ;;  %p2157_p8 = scmp.lt.u32.totalorder %s1233_s21, %s4037_s1 }
 0x39b   : > { %p2158_p4 = scmp.lt.u32.totalorder %s2156_s23, %s2152_s26  ;;  %p2160_p10 = scmp.lt.u32.totalorder %s2152_s26, %s1233_s21 }
 0x39c   : > { %p2154_p7 = pnand %p2153_p3, %p4038_p0 }
 0x39d   : > { %p2159_p2 = por %p2158_p4, %p2157_p8 }
 0x39e   : > { %p2155_p5 = pneg %p2154_p7 }
 0x39f   : > { %p2161_p1 = por %p2160_p10, %p2159_p2 }
 0x3a1   : > { %p2162_p9 = pnand %p2161_p1, %p2155_p5 }
 0x3a3   : > { %2165 = shalt.err (!%p2162_p9)
}
 0x3a4   : > { %s4039_s16 = sld [smem:[#allocation41_spill]]  ;;  %s1556_s15 = sshll.u32 %s4034_s25, 7 }
 0x3a5   : > { %1669 = dma.vmem_to_hbm [thread:$0]  (%p4038_p0), %s3607_s5, 128, %s1233_s21, %s1202_s4  }
 0x3a6   : > { %s1220_s7 = sshll.u32 %s3576_s27, 4  ;;  %s4040_s18 = sld [smem:[#allocation77_spill]]  ;;  %s1221_s7 = int_to_ptr.vmem [resolvable:$true] %s1220_s7 }
 0x3a7   : > { %s1197_s26 = scalar_lea.sflag [#allocation5], %s2930_s10  ;;  %s2166_s24 = scalar_lea.vmem %s1221_s7, 128 }
 0x3a8   : > { %p2167_p12 = scmp.ne.s32.totalorder %s1221_s7, %s2166_s24  ;;  %s2376_s11 = smov [#allocation15]  }
 0x3a9   : > { %s2170_s19 = sshll.u32 %s2376_s11, 4  ;;  %s2171_s19 = int_to_ptr.vmem [resolvable:$false] %s2170_s19 }
 0x3aa   : > { %p4042_p11 = scmp.ne.s32.totalorder %s4039_s16, 0  ;;  %s2172_s1 = scalar_lea.vmem %s2171_s19, 256 }
 0x3ab   : > { %p2173_p3 = scmp.lt.s32.totalorder %s1221_s7, %s2171_s19  ;;  %p2174_p7 = scmp.lt.s32.totalorder %s2172_s1, %s2166_s24 }
 0x3ac   : > { %s4041_s23 = smov %s4040_s18  ;;  %s3638_s0 = scalar_lea.hbm %s4040_s18, %s1556_s15 }
 0x3ad   : > { %p2168_p13 = pnand %p2167_p12, %p4042_p11  ;;  %p2175_p5 = por %p2174_p7, %p2173_p3 }
 0x3af   : > { %p2169_p6 = pneg %p2168_p13 }
 0x3b1   : > { %p2176_p8 = pnand %p2175_p5, %p2169_p6 }
 0x3b3   : > { %2179 = shalt.err (!%p2176_p8)
}
 0x3b4   : > { %s2180_s10 = scalar_lea.hbm %s3638_s0, 128  ;;  %s2184_s11 = scalar_lea.hbm %s4041_s23, 256 }
 0x3b5   : > { %p2181_p4 = scmp.ne.s32.totalorder %s3638_s0, %s2180_s10  ;;  %p2185_p1 = scmp.lt.u32.totalorder %s3638_s0, %s4041_s23 }
 0x3b6   : > { %p2186_p9 = scmp.lt.u32.totalorder %s2184_s11, %s2180_s10  ;;  %p2188_p13 = scmp.lt.u32.totalorder %s2180_s10, %s3638_s0 }
 0x3b7   : > { %p2182_p2 = pnand %p2181_p4, %p4042_p11 }
 0x3b8   : > { %p2187_p12 = por %p2186_p9, %p2185_p1 }
 0x3b9   : > { %p2183_p10 = pneg %p2182_p2 }
 0x3ba   : > { %p2189_p6 = por %p2188_p13, %p2187_p12 }
 0x3bc   : > { %p2190_p3 = pnand %p2189_p6, %p2183_p10 }
 0x3be   : > { %2193 = shalt.err (!%p2190_p3)
}
 0x3bf   : > { %1668 = dma.vmem_to_hbm [thread:$0]  (%p4042_p11), %s1221_s7, 128, %s3638_s0, %s1197_s26  }
 0x3c0   : > { %s4043_s1 = sshll.u32 %s3602_s20, 7  ;;  %s4044_s8 = sld [smem:[#allocation79_spill]] }
 0x3c1   : > { %s4045_s18 = scalar_lea.vmem [#allocation18], %s3562_s29  ;;  %s2377_s16 = smov [#allocation18]  }
 0x3c2   : > { %s1250_s24 = sshll.u32 %s4045_s18, 4  ;;  %s2198_s27 = sshll.u32 %s2377_s16, 4  ;;  %s1251_s24 = int_to_ptr.vmem [resolvable:$true] %s1250_s24  ;;  %s2199_s27 = int_to_ptr.vmem [resolvable:$false] %s2198_s27 }
 0x3c3   : > { %s2194_s10 = scalar_lea.vmem %s1251_s24, 128  ;;  %s2200_s25 = scalar_lea.vmem %s2199_s27, 256 }
 0x3c4   : > { %p2195_p7 = scmp.ne.s32.totalorder %s1251_s24, %s2194_s10  ;;  %p2201_p4 = scmp.lt.s32.totalorder %s1251_s24, %s2199_s27 }
 0x3c5   : > { %p2202_p11 = scmp.lt.s32.totalorder %s2200_s25, %s2194_s10 }
 0x3c6   : > { %s3663_s28 = scalar_lea.hbm %s4044_s8, %s4043_s1  ;;  %p2196_p5 = pnand %p2195_p7, %p4038_p0 }
 0x3c7   : > { %p2203_p2 = por %p2202_p11, %p2201_p4 }
 0x3c8   : > { %p2197_p8 = pneg %p2196_p5 }
 0x3ca   : > { %p2204_p10 = pnand %p2203_p2, %p2197_p8 }
 0x3cc   : > { %2207 = shalt.err (!%p2204_p10)
}
 0x3cd   : > { %s2208_s29 = scalar_lea.hbm %s3663_s28, 128  ;;  %s2212_s0 = scalar_lea.hbm %s4044_s8, 512 }
 0x3ce   : > { %p2209_p1 = scmp.ne.s32.totalorder %s3663_s28, %s2208_s29  ;;  %p2213_p13 = scmp.lt.u32.totalorder %s3663_s28, %s4044_s8 }
 0x3cf   : > { %p2214_p6 = scmp.lt.u32.totalorder %s2212_s0, %s2208_s29  ;;  %p2216_p7 = scmp.lt.u32.totalorder %s2208_s29, %s3663_s28 }
 0x3d0   : > { %p2210_p9 = pnand %p2209_p1, %p4038_p0 }
 0x3d1   : > { %p2215_p3 = por %p2214_p6, %p2213_p13 }
 0x3d2   : > { %p2211_p12 = pneg %p2210_p9 }
 0x3d3   : > { %p2217_p5 = por %p2216_p7, %p2215_p3 }
 0x3d5   : > { %p2218_p8 = pnand %p2217_p5, %p2211_p12 }
 0x3d7   : > { %2221 = shalt.err (!%p2218_p8)
}
 0x3d8   : > { %1670 = dma.vmem_to_hbm [thread:$0]  (%p4038_p0), %s1251_s24, 128, %s3663_s28, %s1202_s4  }
 0x3d9 PF: > { %s4046_s5 = sld [smem:[#allocation26_spill]]  ;;  %s4047_s19 = sld [smem:[#allocation44_spill]] }
 0x3da   : > { %p1707_p4 = scmp.ge.s32.totalorder %s2360_s22, 2 }
 0x3df   : > { %s1262_s1 = sand.u32 1, %s4046_s5   ;;  %p4048_p11 = scmp.ne.s32.totalorder %s4047_s19, 0 }
 0x3e0   : > { %s1263_s21 = scalar_lea.sflag [#allocation5], %s1262_s1 }
 0x3e1   : > { %p1697_p2 = pnand %p1707_p4, %p4048_p11 }
 0x3e3   : > { %2299 = dma.done.wait (!%p1697_p2), %s1263_s21, 128  }
 0x3e4   : > { %2301 = vsyncadd (!%p1697_p2), %s1263_s21, 4294967168  ;;  %s4049_s15 = sadd.s32 4294967294, %s2360_s22   ;;  %s4050_s18 = sld [smem:[#allocation45_spill]] }
 0x3e5   : > { %s1271_s10 = sand.u32 1, %s4049_s15  }
 0x3e6   : > { %s1272_s12 = scalar_lea.sflag [#allocation17], %s1271_s10 }
 0x3ea   : > { %p4051_p10 = scmp.ne.s32.totalorder %s4050_s18, 0 }
 0x3ec   : > { %p1700_p1 = pnand %p1707_p4, %p4051_p10 }
 0x3ee   : > { %2303 = dma.done.wait (!%p1700_p1), %s1272_s12, 256  }
 0x3ef   : > { %2305 = vsyncadd (!%p1700_p1), %s1272_s12, 4294967040  ;;  %s38_s22 = sadd.s32 1, %s2360_s22   ;;  %s4053_s4 = sld [smem:[#allocation27_spill]] }
 0x3f0   : > { %p3695_p0 = scmp.ge.s32.totalorder %s38_s22, 6   ;;  %s4054_s10 = sld [smem:[#allocation28_spill]] }
 0x3f1   : > { %s4055_s11 = sld [smem:[#allocation43_spill]]  ;;  %s4056_s12 = sld [smem:[#allocation29_spill]] }
 0x3f2   : > { %s4057_s28 = smov %s2770_s13  ;;  %s4058_s15 = sld [smem:[#allocation31_spill]] }
 0x3f3   : > { %s4059_s24 = sld [smem:[#allocation48_spill]]  ;;  %s4060_s18 = sld [smem:[#allocation34_spill]] }
 0x3f4   : > { %s4061_s19 = sld [smem:[#allocation35_spill]]  ;;  %s4062_s20 = sld [smem:[#allocation47_spill]] }
 0x3f5   : > { %s4063_s21 = sld [smem:[#allocation39_spill]]  ;;  %s4065_s30 = smov %s4053_s4 }
 0x3f6   : > { %s4066_s13 = smov %s2328_s14  ;;  %s4067_s14 = smov %s4057_s28 }
 0x3f7   : > { %s4068_s16 = smov %s2340_s17  ;;  %37 = sbr.rel (!%p3695_p0) target bundleno = 29 (0x1d), region = 205 }
 0x3f9   : > { %s4069_s17 = smov %s4059_s24 }
 0x3fe   :  { %1286 = vsyncpa [#allocation4], 1 }
 0x3ff   :  { %1288 = vsyncpa [#allocation4 + $0x1], 1 }
 0x400   :  { %1289 = vsyncpa [#allocation7], 1 }
 0x401   :  { %1291 = vsyncpa [#allocation7 + $0x1], 1 }
 0x402   :  { %1292 = vsyncpa [#allocation10], 1 }
 0x403   :  { %1294 = vsyncpa [#allocation10 + $0x1], 1 }
 0x404   :  { %1295 = vsyncpa [#allocation13], 1 }
 0x405   :  { %1297 = vsyncpa [#allocation13 + $0x1], 1 }
 0x406   :  { %1298 = vsyncpa [#allocation5], 1 }
 0x407   :  { %1300 = vsyncpa [#allocation5 + $0x1], 1 }
 0x408   :  { %1301 = vsyncpa [#allocation17], 1 }
 0x409   :  { %1303 = vsyncpa [#allocation17 + $0x1], 1 }

</bundles_post_ra>
